<compile_context>
chip_gen: v7x
topology: tpu7x:2x2x1
jax: 0.10.0
libtpu: 0.0.40
codegen_flags: <defaults>
</compile_context>

<pallas_src>
import jax
import jax.numpy as jnp
from jax.experimental import pallas as pl
from jax.experimental.pallas import tpu as pltpu

# ---------------- small synthetic BERT configuration ----------------
BATCH      = 2
SEQ        = 8
HIDDEN     = 32
NUM_HEADS  = 4
HEAD_DIM   = HIDDEN // NUM_HEADS
FFN        = 64
NUM_LAYERS = 2
VOCAB      = 50
MAX_POS    = 16
NUM_LABELS = 3
ALPHA      = 0.5     # gradient-reversal strength (backward only -> identity in forward)
BETA       = 0.1
LN_EPS     = 1e-12
DTYPE      = jnp.float32


# ============================ Pallas kernels ============================

def _bert_encoder_kernel(x_ref, mask_ref, emb_g_ref, emb_b_ref,
                         wqkv_ref, bqkv_ref, wo_ref, bo_ref,
                         ln1_g_ref, ln1_b_ref, w1_ref, b1_ref,
                         w2_ref, b2_ref, ln2_g_ref, ln2_b_ref,
                         pool_w_ref, pool_b_ref, pooled_ref):
    """One grid step = one sequence of one branch (src or tgt).

    x_ref:    (1, 1, S, H)   summed embeddings
    mask_ref: (1, 1, 1, S)   additive attention mask
    weights:  stacked over layers, whole tensors resident in VMEM
    pooled_ref: (1, 1, 1, H) pooler output (tanh(W * h[CLS] + b))
    """
    f32 = jnp.float32

    def layer_norm(xx, g, b):
        mean = jnp.mean(xx, axis=-1, keepdims=True)
        var = jnp.mean(jnp.square(xx - mean), axis=-1, keepdims=True)
        return (xx - mean) * jax.lax.rsqrt(var + LN_EPS) * g + b

    x = x_ref[0, 0].astype(f32)            # [S, H]
    add_mask = mask_ref[0, 0].astype(f32)  # [1, S] additive (key positions)

    h = layer_norm(x, emb_g_ref[...], emb_b_ref[...])

    scale = 1.0 / float(HEAD_DIM) ** 0.5
    for l in range(NUM_LAYERS):
        # ---- fused QKV projection: one [S,H] x [H,3H] matmul ----
        qkv = jnp.dot(h, wqkv_ref[l], preferred_element_type=f32) + bqkv_ref[l]   # [S, 3H]

        # ---- multi-head attention; head split via lane slices, head merge fused
        #      into the output projection (ctx @ Wo == sum_h ctx_h @ Wo[rows_h]) ----
        wo_l = wo_ref[l]                                                           # [H, H]
        attn_acc = jnp.zeros((SEQ, HIDDEN), dtype=f32)
        for hh in range(NUM_HEADS):
            lo = hh * HEAD_DIM
            qh = qkv[:, lo:lo + HEAD_DIM]                                          # [S, DH]
            kh = qkv[:, HIDDEN + lo:HIDDEN + lo + HEAD_DIM]                        # [S, DH]
            vh = qkv[:, 2 * HIDDEN + lo:2 * HIDDEN + lo + HEAD_DIM]                # [S, DH]
            # scores: contract over head_dim -> [S, S]
            sc = jax.lax.dot_general(qh, kh, (((1,), (1,)), ((), ())),
                                     preferred_element_type=f32) * scale
            sc = sc + add_mask
            mx = jnp.max(sc, axis=-1, keepdims=True)
            p = jnp.exp(sc - mx)
            p = p * pl.reciprocal(jnp.sum(p, axis=-1, keepdims=True), approx=True)
            ctx_h = jnp.dot(p, vh, preferred_element_type=f32)                     # [S, DH]
            attn_acc = attn_acc + jnp.dot(ctx_h, wo_l[lo:lo + HEAD_DIM, :],
                                          preferred_element_type=f32)
        attn_out = attn_acc + bo_ref[l]

        h = layer_norm(attn_out + h, ln1_g_ref[l], ln1_b_ref[l])

        # ---- FFN ----
        ff = jnp.dot(h, w1_ref[l], preferred_element_type=f32) + b1_ref[l]
        # TODO(synk): HF BERT uses exact (erf) GELU; tanh approximation kept for a
        # TPU-friendly EUP lowering.
        ff = jax.nn.gelu(ff, approximate=True)
        ff = jnp.dot(ff, w2_ref[l], preferred_element_type=f32) + b2_ref[l]
        h = layer_norm(ff + h, ln2_g_ref[l], ln2_b_ref[l])

    # ---- pooler on the [CLS] token ----
    cls = h[0:1, :]                                                                # [1, H]
    pooled = jnp.tanh(jnp.dot(cls, pool_w_ref[...], preferred_element_type=f32)
                      + pool_b_ref[...])
    pooled_ref[0, 0] = pooled.astype(pooled_ref.dtype)


def bert_encoder(x, ext_mask, bp):
    """x: [2, B, S, H] embeddings, ext_mask: [2, B, 1, S] additive mask.
    Returns pooled output [2, B, 1, H]."""
    TWO, B, S, H = x.shape
    L = NUM_LAYERS
    const2 = lambda a, b: (0, 0)
    const3 = lambda a, b: (0, 0, 0)
    in_specs = [
        pl.BlockSpec((1, 1, S, H), lambda a, b: (a, b, 0, 0)),   # x
        pl.BlockSpec((1, 1, 1, S), lambda a, b: (a, b, 0, 0)),   # additive mask
        pl.BlockSpec((1, H), const2),                            # emb_ln_g
        pl.BlockSpec((1, H), const2),                            # emb_ln_b
        pl.BlockSpec((L, H, 3 * H), const3),                     # wqkv
        pl.BlockSpec((L, 1, 3 * H), const3),                     # bqkv
        pl.BlockSpec((L, H, H), const3),                         # wo
        pl.BlockSpec((L, 1, H), const3),                         # bo
        pl.BlockSpec((L, 1, H), const3),                         # ln1_g
        pl.BlockSpec((L, 1, H), const3),                         # ln1_b
        pl.BlockSpec((L, H, FFN), const3),                       # w1
        pl.BlockSpec((L, 1, FFN), const3),                       # b1
        pl.BlockSpec((L, FFN, H), const3),                       # w2
        pl.BlockSpec((L, 1, H), const3),                         # b2
        pl.BlockSpec((L, 1, H), const3),                         # ln2_g
        pl.BlockSpec((L, 1, H), const3),                         # ln2_b
        pl.BlockSpec((H, H), const2),                            # pool_w
        pl.BlockSpec((1, H), const2),                            # pool_b
    ]
    out_specs = pl.BlockSpec((1, 1, 1, H), lambda a, b: (a, b, 0, 0))
    return pl.pallas_call(
        _bert_encoder_kernel,
        out_shape=jax.ShapeDtypeStruct((TWO, B, 1, H), DTYPE),
        grid=(TWO, B),
        in_specs=in_specs,
        out_specs=out_specs,
        compiler_params=pltpu.CompilerParams(
            dimension_semantics=("parallel", "parallel")),       # src/tgt x batch; shards on v7x
    )(x, ext_mask,
      bp["emb_ln_g"], bp["emb_ln_b"],
      bp["wqkv"], bp["bqkv"], bp["wo"], bp["bo"],
      bp["ln1_g"], bp["ln1_b"], bp["w1"], bp["b1"],
      bp["w2"], bp["b2"], bp["ln2_g"], bp["ln2_b"],
      bp["pool_w"], bp["pool_b"])


def _heads_loss_kernel(pooled_ref, labels_ref, clf_w_ref, clf_b_ref,
                       hm_w_ref, hm_b_ref, loss_ref, hm_logits_ref):
    """Fused classifier heads + all three mean-reduction cross-entropies.

    pooled_ref:  (2, B, H)   [0]=source pooled, [1]=target pooled
    labels_ref:  (B, 1) int32 human/machine labels
    loss_ref:    (1, 1)      total = hm_loss + BETA * (CE(src,0) + CE(tgt,1))
    hm_logits_ref: (B, 2)
    """
    f32 = jnp.float32
    src = pooled_ref[0].astype(f32)                                  # [B, H]
    tgt = pooled_ref[1].astype(f32)                                  # [B, H]

    # ReverseLayerF is the identity in the forward pass (alpha only scales grads).
    # TODO(synk): gradient reversal (ALPHA) is a backward-only custom_vjp; not represented here.
    src_logits = jnp.dot(src, clf_w_ref[...], preferred_element_type=f32) + clf_b_ref[...]  # [B, 3]
    hm_logits = jnp.dot(src, hm_w_ref[...], preferred_element_type=f32) + hm_b_ref[...]     # [B, 2]
    tgt_logits = jnp.dot(tgt, hm_w_ref[...], preferred_element_type=f32) + hm_b_ref[...]    # [B, 2]

    def lse(x):                                                      # [B, C] -> [B, 1]
        m = jnp.max(x, axis=-1, keepdims=True)
        return m + jnp.log(jnp.sum(jnp.exp(x - m), axis=-1, keepdims=True))

    inv_b = 1.0 / BATCH

    # human/machine CE: dynamic labels, one-hot mask built in-kernel (no HBM one-hot).
    lbl = labels_ref[...]                                            # [B, 1] int32
    cols = jax.lax.broadcasted_iota(jnp.int32, (BATCH, 2), 1)        # [B, 2]
    picked_hm = jnp.sum(jnp.where(cols == lbl, hm_logits, 0.0),
                        axis=-1, keepdims=True)                      # [B, 1]
    hm_loss = jnp.sum(lse(hm_logits) - picked_hm, axis=0, keepdims=True) * inv_b   # [1, 1]

    # domain CE: src labels are all 0, tgt labels are all 1 -> static column picks.
    src_ce = jnp.sum(lse(src_logits) - src_logits[:, 0:1], axis=0, keepdims=True) * inv_b
    tgt_ce = jnp.sum(lse(tgt_logits) - tgt_logits[:, 1:2], axis=0, keepdims=True) * inv_b

    loss_ref[...] = (hm_loss + BETA * (src_ce + tgt_ce)).astype(loss_ref.dtype)
    hm_logits_ref[...] = hm_logits.astype(hm_logits_ref.dtype)


def heads_and_loss(pooled, clf_w, clf_b, hm_w, hm_b, hm_labels_col):
    B = pooled.shape[1]
    H = pooled.shape[2]
    full = lambda shape: pl.BlockSpec(shape, lambda i: tuple(0 for _ in shape))
    loss, hm_logits = pl.pallas_call(
        _heads_loss_kernel,
        out_shape=(jax.ShapeDtypeStruct((1, 1), jnp.float32),
                   jax.ShapeDtypeStruct((B, 2), DTYPE)),
        grid=(1,),
        in_specs=[full((2, B, H)),
                  full((B, 1)),
                  full((H, NUM_LABELS)), full((1, NUM_LABELS)),
                  full((H, 2)), full((1, 2))],
        out_specs=[full((1, 1)), full((B, 2))],
    )(pooled, hm_labels_col, clf_w, clf_b, hm_w, hm_b)
    return loss, hm_logits


# ============================ model (glue + kernels) ============================

def init_params(key):
    keys = iter(jax.random.split(key, 64))

    def w(shape):
        return (0.02 * jax.random.normal(next(keys), shape)).astype(DTYPE)

    def zeros(shape):
        return jnp.zeros(shape, DTYPE)

    def ones(shape):
        return jnp.ones(shape, DTYPE)

    L = NUM_LAYERS
    bert = dict(
        word_emb=w((VOCAB, HIDDEN)),
        pos_emb=w((MAX_POS, HIDDEN)),
        type_emb=w((2, HIDDEN)),
        emb_ln_g=ones((1, HIDDEN)), emb_ln_b=zeros((1, HIDDEN)),
        # per-layer weights stacked along a leading layer axis; QKV fused to [H, 3H]
        wqkv=w((L, HIDDEN, 3 * HIDDEN)), bqkv=zeros((L, 1, 3 * HIDDEN)),
        wo=w((L, HIDDEN, HIDDEN)), bo=zeros((L, 1, HIDDEN)),
        ln1_g=ones((L, 1, HIDDEN)), ln1_b=zeros((L, 1, HIDDEN)),
        w1=w((L, HIDDEN, FFN)), b1=zeros((L, 1, FFN)),
        w2=w((L, FFN, HIDDEN)), b2=zeros((L, 1, HIDDEN)),
        ln2_g=ones((L, 1, HIDDEN)), ln2_b=zeros((L, 1, HIDDEN)),
        pool_w=w((HIDDEN, HIDDEN)), pool_b=zeros((1, HIDDEN)),
    )
    return dict(
        bert=bert,
        clf_w=w((HIDDEN, NUM_LABELS)), clf_b=zeros((1, NUM_LABELS)),   # self.classifier
        hm_w=w((HIDDEN, 2)), hm_b=zeros((1, 2)),                       # self.human_machine_clf
    )


@jax.jit
def domain_adaptation_forward(params, src_ids, src_mask, tgt_ids, tgt_mask, hm_labels):
    bp = params["bert"]
    B, S = src_ids.shape

    # --- batch source + target into one encoder pass: leading axis 0=src, 1=tgt ---
    ids = jnp.stack([src_ids, tgt_ids], axis=0)                      # [2, B, S]
    mask = jnp.stack([src_mask, tgt_mask], axis=0)                   # [2, B, S]

    # embeddings (gather is plain-JAX glue; token_type_ids = 0, position ids = arange)
    x = (jnp.take(bp["word_emb"], ids, axis=0)
         + bp["pos_emb"][:S][None, None, :, :]
         + bp["type_emb"][0][None, None, None, :]).astype(DTYPE)     # [2, B, S, H]
    ext_mask = ((1.0 - mask.astype(DTYPE)) * -10000.0)[:, :, None, :]  # [2, B, 1, S]

    pooled = bert_encoder(x, ext_mask, bp)                           # [2, B, 1, H]
    pooled = pooled.reshape(2, B, HIDDEN)

    loss, hm_logits = heads_and_loss(
        pooled, params["clf_w"], params["clf_b"],
        params["hm_w"], params["hm_b"],
        hm_labels.astype(jnp.int32).reshape(B, 1))
    return loss[0, 0], hm_logits


# ============================ driver ============================

if __name__ == "__main__":
    key = jax.random.PRNGKey(0)
    pk, dk1, dk2, lk = jax.random.split(key, 4)

    params = init_params(pk)
    src_ids = jax.random.randint(dk1, (BATCH, SEQ), 0, VOCAB, dtype=jnp.int32)
    tgt_ids = jax.random.randint(dk2, (BATCH, SEQ), 0, VOCAB, dtype=jnp.int32)
    src_mask = jnp.ones((BATCH, SEQ), dtype=jnp.int32)
    tgt_mask = jnp.ones((BATCH, SEQ), dtype=jnp.int32)
    hm_labels = jax.random.randint(lk, (BATCH,), 0, 2, dtype=jnp.int32)

    total_loss, hm_logits = domain_adaptation_forward(
        params, src_ids, src_mask, tgt_ids, tgt_mask, hm_labels)
    jax.block_until_ready((total_loss, hm_logits))

    assert hm_logits.shape == (BATCH, 2)
    assert total_loss.shape == ()
    assert bool(jnp.isfinite(total_loss))
    print("KERNEL_OK")
</pallas_src>

<mosaic_0001>
module attributes {stable_mosaic.version = 11 : i64} {
  func.func @_heads_loss_kernel(%arg0: i32, %arg1: memref<2x2x32xf32, #tpu.memory_space<vmem>>, %arg2: memref<2x1xi32, #tpu.memory_space<vmem>>, %arg3: memref<32x3xf32, #tpu.memory_space<vmem>>, %arg4: memref<1x3xf32, #tpu.memory_space<vmem>>, %arg5: memref<32x2xf32, #tpu.memory_space<vmem>>, %arg6: memref<1x2xf32, #tpu.memory_space<vmem>>, %arg7: memref<1x1xf32, #tpu.memory_space<vmem>>, %arg8: memref<2x2xf32, #tpu.memory_space<vmem>>) attributes {dimension_semantics = [#tpu.dimension_semantics<arbitrary>], iteration_bounds = array<i64: 1>, scalar_prefetch = 0 : i64, scratch_operands = 0 : i64, tpu.core_type = #tpu.core_type<tc>, window_params = [{pipeline_mode = #tpu.pipeline_mode<synchronous>, transform_indices = @transform_0, window_bounds = array<i64: 2, 2, 32>}, {pipeline_mode = #tpu.pipeline_mode<synchronous>, transform_indices = @transform_1, window_bounds = array<i64: 2, 1>}, {pipeline_mode = #tpu.pipeline_mode<synchronous>, transform_indices = @transform_2, window_bounds = array<i64: 32, 3>}, {pipeline_mode = #tpu.pipeline_mode<synchronous>, transform_indices = @transform_3, window_bounds = array<i64: 1, 3>}, {pipeline_mode = #tpu.pipeline_mode<synchronous>, transform_indices = @transform_4, window_bounds = array<i64: 32, 2>}, {pipeline_mode = #tpu.pipeline_mode<synchronous>, transform_indices = @transform_5, window_bounds = array<i64: 1, 2>}, {pipeline_mode = #tpu.pipeline_mode<synchronous>, transform_indices = @transform_6, window_bounds = array<i64: 1, 1>}, {pipeline_mode = #tpu.pipeline_mode<synchronous>, transform_indices = @transform_7, window_bounds = array<i64: 2, 2>}]} {
    %c0 = arith.constant 0 : index
    %c0_0 = arith.constant 0 : index
    %c0_1 = arith.constant 0 : index
    %0 = vector.load %arg1[%c0, %c0_0, %c0_1] : memref<2x2x32xf32, #tpu.memory_space<vmem>>, vector<1x2x32xf32>
    %1 = vector.shape_cast %0 : vector<1x2x32xf32> to vector<2x32xf32>
    %c1 = arith.constant 1 : index
    %c0_2 = arith.constant 0 : index
    %c0_3 = arith.constant 0 : index
    %2 = vector.load %arg1[%c1, %c0_2, %c0_3] : memref<2x2x32xf32, #tpu.memory_space<vmem>>, vector<1x2x32xf32>
    %3 = vector.shape_cast %2 : vector<1x2x32xf32> to vector<2x32xf32>
    %c0_4 = arith.constant 0 : index
    %c0_5 = arith.constant 0 : index
    %4 = vector.load %arg3[%c0_4, %c0_5] : memref<32x3xf32, #tpu.memory_space<vmem>>, vector<32x3xf32>
    %cst = arith.constant dense<0.000000e+00> : vector<2x3xf32>
    %5 = tpu.matmul %1, %4, %cst {dimension_numbers = #tpu.dot_dimension_numbers<[1], [0], [0], [1], [0, 0, 1, 1], [], []>} : vector<2x32xf32>, vector<32x3xf32>, vector<2x3xf32> -> vector<2x3xf32>
    %c0_6 = arith.constant 0 : index
    %c0_7 = arith.constant 0 : index
    %6 = vector.load %arg4[%c0_6, %c0_7] : memref<1x3xf32, #tpu.memory_space<vmem>>, vector<1x3xf32>
    %7 = vector.broadcast %6 : vector<1x3xf32> to vector<2x3xf32>
    %8 = arith.addf %5, %7 : vector<2x3xf32>
    %c0_8 = arith.constant 0 : index
    %c0_9 = arith.constant 0 : index
    %9 = vector.load %arg5[%c0_8, %c0_9] : memref<32x2xf32, #tpu.memory_space<vmem>>, vector<32x2xf32>
    %cst_10 = arith.constant dense<0.000000e+00> : vector<2x2xf32>
    %10 = tpu.matmul %1, %9, %cst_10 {dimension_numbers = #tpu.dot_dimension_numbers<[1], [0], [0], [1], [0, 0, 1, 1], [], []>} : vector<2x32xf32>, vector<32x2xf32>, vector<2x2xf32> -> vector<2x2xf32>
    %c0_11 = arith.constant 0 : index
    %c0_12 = arith.constant 0 : index
    %11 = vector.load %arg6[%c0_11, %c0_12] : memref<1x2xf32, #tpu.memory_space<vmem>>, vector<1x2xf32>
    %12 = vector.broadcast %11 : vector<1x2xf32> to vector<2x2xf32>
    %13 = arith.addf %10, %12 : vector<2x2xf32>
    %c0_13 = arith.constant 0 : index
    %c0_14 = arith.constant 0 : index
    %14 = vector.load %arg5[%c0_13, %c0_14] : memref<32x2xf32, #tpu.memory_space<vmem>>, vector<32x2xf32>
    %cst_15 = arith.constant dense<0.000000e+00> : vector<2x2xf32>
    %15 = tpu.matmul %3, %14, %cst_15 {dimension_numbers = #tpu.dot_dimension_numbers<[1], [0], [0], [1], [0, 0, 1, 1], [], []>} : vector<2x32xf32>, vector<32x2xf32>, vector<2x2xf32> -> vector<2x2xf32>
    %c0_16 = arith.constant 0 : index
    %c0_17 = arith.constant 0 : index
    %16 = vector.load %arg6[%c0_16, %c0_17] : memref<1x2xf32, #tpu.memory_space<vmem>>, vector<1x2xf32>
    %17 = vector.broadcast %16 : vector<1x2xf32> to vector<2x2xf32>
    %18 = arith.addf %15, %17 : vector<2x2xf32>
    %c0_18 = arith.constant 0 : index
    %c0_19 = arith.constant 0 : index
    %19 = vector.load %arg2[%c0_18, %c0_19] : memref<2x1xi32, #tpu.memory_space<vmem>>, vector<2x1xi32>
    %20 = tpu.iota {dimensions = array<i32: 1>} : vector<2x2xi32>
    %21 = vector.broadcast %19 : vector<2x1xi32> to vector<2x2xi32>
    %22 = arith.cmpi eq, %20, %21 : vector<2x2xi32>
    %cst_20 = arith.constant 0.000000e+00 : f32
    %23 = vector.broadcast %cst_20 : f32 to vector<2x2xf32>
    %24 = arith.select %22, %13, %23 : vector<2x2xi1>, vector<2x2xf32>
    %cst_21 = arith.constant dense<0.000000e+00> : vector<2xf32>
    %25 = vector.multi_reduction <add>, %24, %cst_21 [1] : vector<2x2xf32> to vector<2xf32>
    %26 = vector.shape_cast %25 : vector<2xf32> to vector<2x1xf32>
    %cst_22 = arith.constant dense<0xFF800000> : vector<2xf32>
    %27 = vector.multi_reduction <maximumf>, %13, %cst_22 [1] : vector<2x2xf32> to vector<2xf32>
    %28 = vector.shape_cast %27 : vector<2xf32> to vector<2x1xf32>
    %29 = vector.broadcast %28 : vector<2x1xf32> to vector<2x2xf32>
    %30 = arith.subf %13, %29 : vector<2x2xf32>
    %31 = math.exp %30 : vector<2x2xf32>
    %cst_23 = arith.constant dense<0.000000e+00> : vector<2xf32>
    %32 = vector.multi_reduction <add>, %31, %cst_23 [1] : vector<2x2xf32> to vector<2xf32>
    %33 = vector.shape_cast %32 : vector<2xf32> to vector<2x1xf32>
    %34 = math.log %33 : vector<2x1xf32>
    %35 = arith.addf %28, %34 : vector<2x1xf32>
    %36 = arith.subf %35, %26 : vector<2x1xf32>
    %cst_24 = arith.constant dense<0.000000e+00> : vector<1xf32>
    %37 = vector.multi_reduction <add>, %36, %cst_24 [0] : vector<2x1xf32> to vector<1xf32>
    %38 = vector.shape_cast %37 : vector<1xf32> to vector<1x1xf32>
    %cst_25 = arith.constant 5.000000e-01 : f32
    %39 = vector.broadcast %cst_25 : f32 to vector<1x1xf32>
    %40 = arith.mulf %38, %39 : vector<1x1xf32>
    %cst_26 = arith.constant dense<0xFF800000> : vector<2xf32>
    %41 = vector.multi_reduction <maximumf>, %8, %cst_26 [1] : vector<2x3xf32> to vector<2xf32>
    %42 = vector.shape_cast %41 : vector<2xf32> to vector<2x1xf32>
    %43 = vector.broadcast %42 : vector<2x1xf32> to vector<2x3xf32>
    %44 = arith.subf %8, %43 : vector<2x3xf32>
    %45 = math.exp %44 : vector<2x3xf32>
    %cst_27 = arith.constant dense<0.000000e+00> : vector<2xf32>
    %46 = vector.multi_reduction <add>, %45, %cst_27 [1] : vector<2x3xf32> to vector<2xf32>
    %47 = vector.shape_cast %46 : vector<2xf32> to vector<2x1xf32>
    %48 = math.log %47 : vector<2x1xf32>
    %49 = arith.addf %42, %48 : vector<2x1xf32>
    %50 = vector.extract_strided_slice %8 {offsets = [0, 0], sizes = [2, 1], strides = [1, 1]} : vector<2x3xf32> to vector<2x1xf32>
    %51 = arith.subf %49, %50 : vector<2x1xf32>
    %cst_28 = arith.constant dense<0.000000e+00> : vector<1xf32>
    %52 = vector.multi_reduction <add>, %51, %cst_28 [0] : vector<2x1xf32> to vector<1xf32>
    %53 = vector.shape_cast %52 : vector<1xf32> to vector<1x1xf32>
    %cst_29 = arith.constant 5.000000e-01 : f32
    %54 = vector.broadcast %cst_29 : f32 to vector<1x1xf32>
    %55 = arith.mulf %53, %54 : vector<1x1xf32>
    %cst_30 = arith.constant dense<0xFF800000> : vector<2xf32>
    %56 = vector.multi_reduction <maximumf>, %18, %cst_30 [1] : vector<2x2xf32> to vector<2xf32>
    %57 = vector.shape_cast %56 : vector<2xf32> to vector<2x1xf32>
    %58 = vector.broadcast %57 : vector<2x1xf32> to vector<2x2xf32>
    %59 = arith.subf %18, %58 : vector<2x2xf32>
    %60 = math.exp %59 : vector<2x2xf32>
    %cst_31 = arith.constant dense<0.000000e+00> : vector<2xf32>
    %61 = vector.multi_reduction <add>, %60, %cst_31 [1] : vector<2x2xf32> to vector<2xf32>
    %62 = vector.shape_cast %61 : vector<2xf32> to vector<2x1xf32>
    %63 = math.log %62 : vector<2x1xf32>
    %64 = arith.addf %57, %63 : vector<2x1xf32>
    %65 = vector.extract_strided_slice %18 {offsets = [0, 1], sizes = [2, 1], strides = [1, 1]} : vector<2x2xf32> to vector<2x1xf32>
    %66 = arith.subf %64, %65 : vector<2x1xf32>
    %cst_32 = arith.constant dense<0.000000e+00> : vector<1xf32>
    %67 = vector.multi_reduction <add>, %66, %cst_32 [0] : vector<2x1xf32> to vector<1xf32>
    %68 = vector.shape_cast %67 : vector<1xf32> to vector<1x1xf32>
    %cst_33 = arith.constant 5.000000e-01 : f32
    %69 = vector.broadcast %cst_33 : f32 to vector<1x1xf32>
    %70 = arith.mulf %68, %69 : vector<1x1xf32>
    %71 = arith.addf %55, %70 : vector<1x1xf32>
    %cst_34 = arith.constant 1.000000e-01 : f32
    %72 = vector.broadcast %cst_34 : f32 to vector<1x1xf32>
    %73 = arith.mulf %72, %71 : vector<1x1xf32>
    %74 = arith.addf %40, %73 : vector<1x1xf32>
    %c0_35 = arith.constant 0 : index
    %c0_36 = arith.constant 0 : index
    %75 = vector.load %arg7[%c0_35, %c0_36] : memref<1x1xf32, #tpu.memory_space<vmem>>, vector<1x1xf32>
    tpu.vector_store %arg7[%c0_35, %c0_36], %74 {strides = array<i32>} : memref<1x1xf32, #tpu.memory_space<vmem>>, vector<1x1xf32>,
    %c0_37 = arith.constant 0 : index
    %c0_38 = arith.constant 0 : index
    %76 = vector.load %arg8[%c0_37, %c0_38] : memref<2x2xf32, #tpu.memory_space<vmem>>, vector<2x2xf32>
    tpu.vector_store %arg8[%c0_37, %c0_38], %13 {strides = array<i32>} : memref<2x2xf32, #tpu.memory_space<vmem>>, vector<2x2xf32>,
    return
  }
  func.func @transform_0(%arg0: i32) -> (i32, i32, i32) {
    %c0_i32 = arith.constant 0 : i32
    %c0_i32_0 = arith.constant 0 : i32
    %c0_i32_1 = arith.constant 0 : i32
    %c0_i32_2 = arith.constant 0 : i32
    return %c0_i32, %c0_i32_0, %c0_i32_1 : i32, i32, i32
  }
  func.func @transform_1(%arg0: i32) -> (i32, i32) {
    %c0_i32 = arith.constant 0 : i32
    %c0_i32_0 = arith.constant 0 : i32
    %c0_i32_1 = arith.constant 0 : i32
    return %c0_i32, %c0_i32_0 : i32, i32
  }
  func.func @transform_2(%arg0: i32) -> (i32, i32) {
    %c0_i32 = arith.constant 0 : i32
    %c0_i32_0 = arith.constant 0 : i32
    %c0_i32_1 = arith.constant 0 : i32
    return %c0_i32, %c0_i32_0 : i32, i32
  }
  func.func @transform_3(%arg0: i32) -> (i32, i32) {
    %c0_i32 = arith.constant 0 : i32
    %c0_i32_0 = arith.constant 0 : i32
    %c0_i32_1 = arith.constant 0 : i32
    return %c0_i32, %c0_i32_0 : i32, i32
  }
  func.func @transform_4(%arg0: i32) -> (i32, i32) {
    %c0_i32 = arith.constant 0 : i32
    %c0_i32_0 = arith.constant 0 : i32
    %c0_i32_1 = arith.constant 0 : i32
    return %c0_i32, %c0_i32_0 : i32, i32
  }
  func.func @transform_5(%arg0: i32) -> (i32, i32) {
    %c0_i32 = arith.constant 0 : i32
    %c0_i32_0 = arith.constant 0 : i32
    %c0_i32_1 = arith.constant 0 : i32
    return %c0_i32, %c0_i32_0 : i32, i32
  }
  func.func @transform_6(%arg0: i32) -> (i32, i32) {
    %c0_i32 = arith.constant 0 : i32
    %c0_i32_0 = arith.constant 0 : i32
    %c0_i32_1 = arith.constant 0 : i32
    return %c0_i32, %c0_i32_0 : i32, i32
  }
  func.func @transform_7(%arg0: i32) -> (i32, i32) {
    %c0_i32 = arith.constant 0 : i32
    %c0_i32_0 = arith.constant 0 : i32
    %c0_i32_1 = arith.constant 0 : i32
    return %c0_i32, %c0_i32_0 : i32, i32
  }
}

module attributes {stable_mosaic.version = 11 : i64} {
  func.func @_bert_encoder_kernel(%arg0: i32, %arg1: i32, %arg2: memref<1x1x8x32xf32, #tpu.memory_space<vmem>>, %arg3: memref<1x1x1x8xf32, #tpu.memory_space<vmem>>, %arg4: memref<1x32xf32, #tpu.memory_space<vmem>>, %arg5: memref<1x32xf32, #tpu.memory_space<vmem>>, %arg6: memref<2x32x96xf32, #tpu.memory_space<vmem>>, %arg7: memref<2x1x96xf32, #tpu.memory_space<vmem>>, %arg8: memref<2x32x32xf32, #tpu.memory_space<vmem>>, %arg9: memref<2x1x32xf32, #tpu.memory_space<vmem>>, %arg10: memref<2x1x32xf32, #tpu.memory_space<vmem>>, %arg11: memref<2x1x32xf32, #tpu.memory_space<vmem>>, %arg12: memref<2x32x64xf32, #tpu.memory_space<vmem>>, %arg13: memref<2x1x64xf32, #tpu.memory_space<vmem>>, %arg14: memref<2x64x32xf32, #tpu.memory_space<vmem>>, %arg15: memref<2x1x32xf32, #tpu.memory_space<vmem>>, %arg16: memref<2x1x32xf32, #tpu.memory_space<vmem>>, %arg17: memref<2x1x32xf32, #tpu.memory_space<vmem>>, %arg18: memref<32x32xf32, #tpu.memory_space<vmem>>, %arg19: memref<1x32xf32, #tpu.memory_space<vmem>>, %arg20: memref<1x1x1x32xf32, #tpu.memory_space<vmem>>) attributes {dimension_semantics = [#tpu.dimension_semantics<parallel>, #tpu.dimension_semantics<parallel>], iteration_bounds = array<i64: 2, 2>, scalar_prefetch = 0 : i64, scratch_operands = 0 : i64, tpu.core_type = #tpu.core_type<tc>, window_params = [{transform_indices = @transform_0, window_bounds = array<i64: 1, 1, 8, 32>}, {transform_indices = @transform_1, window_bounds = array<i64: 1, 1, 1, 8>}, {pipeline_mode = #tpu.pipeline_mode<synchronous>, transform_indices = @transform_2, window_bounds = array<i64: 1, 32>}, {pipeline_mode = #tpu.pipeline_mode<synchronous>, transform_indices = @transform_3, window_bounds = array<i64: 1, 32>}, {pipeline_mode = #tpu.pipeline_mode<synchronous>, transform_indices = @transform_4, window_bounds = array<i64: 2, 32, 96>}, {pipeline_mode = #tpu.pipeline_mode<synchronous>, transform_indices = @transform_5, window_bounds = array<i64: 2, 1, 96>}, {pipeline_mode = #tpu.pipeline_mode<synchronous>, transform_indices = @transform_6, window_bounds = array<i64: 2, 32, 32>}, {pipeline_mode = #tpu.pipeline_mode<synchronous>, transform_indices = @transform_7, window_bounds = array<i64: 2, 1, 32>}, {pipeline_mode = #tpu.pipeline_mode<synchronous>, transform_indices = @transform_8, window_bounds = array<i64: 2, 1, 32>}, {pipeline_mode = #tpu.pipeline_mode<synchronous>, transform_indices = @transform_9, window_bounds = array<i64: 2, 1, 32>}, {pipeline_mode = #tpu.pipeline_mode<synchronous>, transform_indices = @transform_10, window_bounds = array<i64: 2, 32, 64>}, {pipeline_mode = #tpu.pipeline_mode<synchronous>, transform_indices = @transform_11, window_bounds = array<i64: 2, 1, 64>}, {pipeline_mode = #tpu.pipeline_mode<synchronous>, transform_indices = @transform_12, window_bounds = array<i64: 2, 64, 32>}, {pipeline_mode = #tpu.pipeline_mode<synchronous>, transform_indices = @transform_13, window_bounds = array<i64: 2, 1, 32>}, {pipeline_mode = #tpu.pipeline_mode<synchronous>, transform_indices = @transform_14, window_bounds = array<i64: 2, 1, 32>}, {pipeline_mode = #tpu.pipeline_mode<synchronous>, transform_indices = @transform_15, window_bounds = array<i64: 2, 1, 32>}, {pipeline_mode = #tpu.pipeline_mode<synchronous>, transform_indices = @transform_16, window_bounds = array<i64: 32, 32>}, {pipeline_mode = #tpu.pipeline_mode<synchronous>, transform_indices = @transform_17, window_bounds = array<i64: 1, 32>}, {transform_indices = @transform_18, window_bounds = array<i64: 1, 1, 1, 32>}]} {
    %c0 = arith.constant 0 : index
    %c0_0 = arith.constant 0 : index
    %c0_1 = arith.constant 0 : index
    %c0_2 = arith.constant 0 : index
    %0 = vector.load %arg2[%c0, %c0_0, %c0_1, %c0_2] : memref<1x1x8x32xf32, #tpu.memory_space<vmem>>, vector<1x1x8x32xf32>
    %1 = vector.shape_cast %0 : vector<1x1x8x32xf32> to vector<8x32xf32>
    %c0_3 = arith.constant 0 : index
    %c0_4 = arith.constant 0 : index
    %c0_5 = arith.constant 0 : index
    %c0_6 = arith.constant 0 : index
    %2 = vector.load %arg3[%c0_3, %c0_4, %c0_5, %c0_6] : memref<1x1x1x8xf32, #tpu.memory_space<vmem>>, vector<1x1x1x8xf32>
    %3 = vector.shape_cast %2 : vector<1x1x1x8xf32> to vector<1x8xf32>
    %c0_7 = arith.constant 0 : index
    %c0_8 = arith.constant 0 : index
    %4 = vector.load %arg4[%c0_7, %c0_8] : memref<1x32xf32, #tpu.memory_space<vmem>>, vector<1x32xf32>
    %c0_9 = arith.constant 0 : index
    %c0_10 = arith.constant 0 : index
    %5 = vector.load %arg5[%c0_9, %c0_10] : memref<1x32xf32, #tpu.memory_space<vmem>>, vector<1x32xf32>
    %cst = arith.constant dense<0.000000e+00> : vector<8xf32>
    %6 = vector.multi_reduction <add>, %1, %cst [1] : vector<8x32xf32> to vector<8xf32>
    %7 = vector.shape_cast %6 : vector<8xf32> to vector<8x1xf32>
    %cst_11 = arith.constant 3.200000e+01 : f32
    %8 = vector.broadcast %cst_11 : f32 to vector<8x1xf32>
    %9 = arith.divf %7, %8 : vector<8x1xf32>
    %10 = vector.broadcast %9 : vector<8x1xf32> to vector<8x32xf32>
    %11 = arith.subf %1, %10 : vector<8x32xf32>
    %12 = arith.mulf %11, %11 : vector<8x32xf32>
    %cst_12 = arith.constant dense<0.000000e+00> : vector<8xf32>
    %13 = vector.multi_reduction <add>, %12, %cst_12 [1] : vector<8x32xf32> to vector<8xf32>
    %14 = vector.shape_cast %13 : vector<8xf32> to vector<8x1xf32>
    %cst_13 = arith.constant 3.200000e+01 : f32
    %15 = vector.broadcast %cst_13 : f32 to vector<8x1xf32>
    %16 = arith.divf %14, %15 : vector<8x1xf32>
    %17 = vector.broadcast %9 : vector<8x1xf32> to vector<8x32xf32>
    %18 = arith.subf %1, %17 : vector<8x32xf32>
    %cst_14 = arith.constant 9.99999996E-13 : f32
    %19 = vector.broadcast %cst_14 : f32 to vector<8x1xf32>
    %20 = arith.addf %16, %19 : vector<8x1xf32>
    %21 = math.rsqrt %20 : vector<8x1xf32>
    %22 = vector.broadcast %21 : vector<8x1xf32> to vector<8x32xf32>
    %23 = arith.mulf %18, %22 : vector<8x32xf32>
    %24 = vector.broadcast %4 : vector<1x32xf32> to vector<8x32xf32>
    %25 = arith.mulf %23, %24 : vector<8x32xf32>
    %26 = vector.broadcast %5 : vector<1x32xf32> to vector<8x32xf32>
    %27 = arith.addf %25, %26 : vector<8x32xf32>
    %c0_15 = arith.constant 0 : index
    %c0_16 = arith.constant 0 : index
    %c0_17 = arith.constant 0 : index
    %28 = vector.load %arg6[%c0_15, %c0_16, %c0_17] : memref<2x32x96xf32, #tpu.memory_space<vmem>>, vector<1x32x96xf32>
    %29 = vector.shape_cast %28 : vector<1x32x96xf32> to vector<32x96xf32>
    %cst_18 = arith.constant dense<0.000000e+00> : vector<8x96xf32>
    %30 = tpu.matmul %27, %29, %cst_18 {dimension_numbers = #tpu.dot_dimension_numbers<[1], [0], [0], [1], [0, 0, 1, 1], [], []>} : vector<8x32xf32>, vector<32x96xf32>, vector<8x96xf32> -> vector<8x96xf32>
    %c0_19 = arith.constant 0 : index
    %c0_20 = arith.constant 0 : index
    %c0_21 = arith.constant 0 : index
    %31 = vector.load %arg7[%c0_19, %c0_20, %c0_21] : memref<2x1x96xf32, #tpu.memory_space<vmem>>, vector<1x1x96xf32>
    %32 = vector.shape_cast %31 : vector<1x1x96xf32> to vector<1x96xf32>
    %33 = vector.broadcast %32 : vector<1x96xf32> to vector<8x96xf32>
    %34 = arith.addf %30, %33 : vector<8x96xf32>
    %c0_22 = arith.constant 0 : index
    %c0_23 = arith.constant 0 : index
    %c0_24 = arith.constant 0 : index
    %35 = vector.load %arg8[%c0_22, %c0_23, %c0_24] : memref<2x32x32xf32, #tpu.memory_space<vmem>>, vector<1x32x32xf32>
    %36 = vector.shape_cast %35 : vector<1x32x32xf32> to vector<32x32xf32>
    %cst_25 = arith.constant 0.000000e+00 : f32
    %37 = vector.broadcast %cst_25 : f32 to vector<8x32xf32>
    %38 = vector.extract_strided_slice %34 {offsets = [0, 0], sizes = [8, 8], strides = [1, 1]} : vector<8x96xf32> to vector<8x8xf32>
    %39 = vector.extract_strided_slice %34 {offsets = [0, 32], sizes = [8, 8], strides = [1, 1]} : vector<8x96xf32> to vector<8x8xf32>
    %40 = vector.extract_strided_slice %34 {offsets = [0, 64], sizes = [8, 8], strides = [1, 1]} : vector<8x96xf32> to vector<8x8xf32>
    %cst_26 = arith.constant dense<0.000000e+00> : vector<8x8xf32>
    %41 = tpu.matmul %38, %39, %cst_26 {dimension_numbers = #tpu.dot_dimension_numbers<[1], [1], [0], [0], [0, 0, 1, 0], [], []>} : vector<8x8xf32>, vector<8x8xf32>, vector<8x8xf32> -> vector<8x8xf32>
    %cst_27 = arith.constant 0.353553385 : f32
    %42 = vector.broadcast %cst_27 : f32 to vector<8x8xf32>
    %43 = arith.mulf %41, %42 : vector<8x8xf32>
    %44 = vector.broadcast %3 : vector<1x8xf32> to vector<8x8xf32>
    %45 = arith.addf %43, %44 : vector<8x8xf32>
    %cst_28 = arith.constant dense<0xFF800000> : vector<8xf32>
    %46 = vector.multi_reduction <maximumf>, %45, %cst_28 [1] : vector<8x8xf32> to vector<8xf32>
    %47 = vector.shape_cast %46 : vector<8xf32> to vector<8x1xf32>
    %48 = vector.broadcast %47 : vector<8x1xf32> to vector<8x8xf32>
    %49 = arith.subf %45, %48 : vector<8x8xf32>
    %50 = math.exp %49 : vector<8x8xf32>
    %cst_29 = arith.constant dense<0.000000e+00> : vector<8xf32>
    %51 = vector.multi_reduction <add>, %50, %cst_29 [1] : vector<8x8xf32> to vector<8xf32>
    %52 = vector.shape_cast %51 : vector<8xf32> to vector<8x1xf32>
    %53 = tpu.reciprocal %52 {approx = true} : vector<8x1xf32> -> vector<8x1xf32>
    %54 = vector.broadcast %53 : vector<8x1xf32> to vector<8x8xf32>
    %55 = arith.mulf %50, %54 : vector<8x8xf32>
    %cst_30 = arith.constant dense<0.000000e+00> : vector<8x8xf32>
    %56 = tpu.matmul %55, %40, %cst_30 {dimension_numbers = #tpu.dot_dimension_numbers<[1], [0], [0], [1], [0, 0, 1, 1], [], []>} : vector<8x8xf32>, vector<8x8xf32>, vector<8x8xf32> -> vector<8x8xf32>
    %57 = vector.extract_strided_slice %36 {offsets = [0, 0], sizes = [8, 32], strides = [1, 1]} : vector<32x32xf32> to vector<8x32xf32>
    %cst_31 = arith.constant dense<0.000000e+00> : vector<8x32xf32>
    %58 = tpu.matmul %56, %57, %cst_31 {dimension_numbers = #tpu.dot_dimension_numbers<[1], [0], [0], [1], [0, 0, 1, 1], [], []>} : vector<8x8xf32>, vector<8x32xf32>, vector<8x32xf32> -> vector<8x32xf32>
    %59 = arith.addf %37, %58 : vector<8x32xf32>
    %60 = vector.extract_strided_slice %34 {offsets = [0, 8], sizes = [8, 8], strides = [1, 1]} : vector<8x96xf32> to vector<8x8xf32>
    %61 = vector.extract_strided_slice %34 {offsets = [0, 40], sizes = [8, 8], strides = [1, 1]} : vector<8x96xf32> to vector<8x8xf32>
    %62 = vector.extract_strided_slice %34 {offsets = [0, 72], sizes = [8, 8], strides = [1, 1]} : vector<8x96xf32> to vector<8x8xf32>
    %cst_32 = arith.constant dense<0.000000e+00> : vector<8x8xf32>
    %63 = tpu.matmul %60, %61, %cst_32 {dimension_numbers = #tpu.dot_dimension_numbers<[1], [1], [0], [0], [0, 0, 1, 0], [], []>} : vector<8x8xf32>, vector<8x8xf32>, vector<8x8xf32> -> vector<8x8xf32>
    %cst_33 = arith.constant 0.353553385 : f32
    %64 = vector.broadcast %cst_33 : f32 to vector<8x8xf32>
    %65 = arith.mulf %63, %64 : vector<8x8xf32>
    %66 = vector.broadcast %3 : vector<1x8xf32> to vector<8x8xf32>
    %67 = arith.addf %65, %66 : vector<8x8xf32>
    %cst_34 = arith.constant dense<0xFF800000> : vector<8xf32>
    %68 = vector.multi_reduction <maximumf>, %67, %cst_34 [1] : vector<8x8xf32> to vector<8xf32>
    %69 = vector.shape_cast %68 : vector<8xf32> to vector<8x1xf32>
    %70 = vector.broadcast %69 : vector<8x1xf32> to vector<8x8xf32>
    %71 = arith.subf %67, %70 : vector<8x8xf32>
    %72 = math.exp %71 : vector<8x8xf32>
    %cst_35 = arith.constant dense<0.000000e+00> : vector<8xf32>
    %73 = vector.multi_reduction <add>, %72, %cst_35 [1] : vector<8x8xf32> to vector<8xf32>
    %74 = vector.shape_cast %73 : vector<8xf32> to vector<8x1xf32>
    %75 = tpu.reciprocal %74 {approx = true} : vector<8x1xf32> -> vector<8x1xf32>
    %76 = vector.broadcast %75 : vector<8x1xf32> to vector<8x8xf32>
    %77 = arith.mulf %72, %76 : vector<8x8xf32>
    %cst_36 = arith.constant dense<0.000000e+00> : vector<8x8xf32>
    %78 = tpu.matmul %77, %62, %cst_36 {dimension_numbers = #tpu.dot_dimension_numbers<[1], [0], [0], [1], [0, 0, 1, 1], [], []>} : vector<8x8xf32>, vector<8x8xf32>, vector<8x8xf32> -> vector<8x8xf32>
    %79 = vector.extract_strided_slice %36 {offsets = [8, 0], sizes = [8, 32], strides = [1, 1]} : vector<32x32xf32> to vector<8x32xf32>
    %cst_37 = arith.constant dense<0.000000e+00> : vector<8x32xf32>
    %80 = tpu.matmul %78, %79, %cst_37 {dimension_numbers = #tpu.dot_dimension_numbers<[1], [0], [0], [1], [0, 0, 1, 1], [], []>} : vector<8x8xf32>, vector<8x32xf32>, vector<8x32xf32> -> vector<8x32xf32>
    %81 = arith.addf %59, %80 : vector<8x32xf32>
    %82 = vector.extract_strided_slice %34 {offsets = [0, 16], sizes = [8, 8], strides = [1, 1]} : vector<8x96xf32> to vector<8x8xf32>
    %83 = vector.extract_strided_slice %34 {offsets = [0, 48], sizes = [8, 8], strides = [1, 1]} : vector<8x96xf32> to vector<8x8xf32>
    %84 = vector.extract_strided_slice %34 {offsets = [0, 80], sizes = [8, 8], strides = [1, 1]} : vector<8x96xf32> to vector<8x8xf32>
    %cst_38 = arith.constant dense<0.000000e+00> : vector<8x8xf32>
    %85 = tpu.matmul %82, %83, %cst_38 {dimension_numbers = #tpu.dot_dimension_numbers<[1], [1], [0], [0], [0, 0, 1, 0], [], []>} : vector<8x8xf32>, vector<8x8xf32>, vector<8x8xf32> -> vector<8x8xf32>
    %cst_39 = arith.constant 0.353553385 : f32
    %86 = vector.broadcast %cst_39 : f32 to vector<8x8xf32>
    %87 = arith.mulf %85, %86 : vector<8x8xf32>
    %88 = vector.broadcast %3 : vector<1x8xf32> to vector<8x8xf32>
    %89 = arith.addf %87, %88 : vector<8x8xf32>
    %cst_40 = arith.constant dense<0xFF800000> : vector<8xf32>
    %90 = vector.multi_reduction <maximumf>, %89, %cst_40 [1] : vector<8x8xf32> to vector<8xf32>
    %91 = vector.shape_cast %90 : vector<8xf32> to vector<8x1xf32>
    %92 = vector.broadcast %91 : vector<8x1xf32> to vector<8x8xf32>
    %93 = arith.subf %89, %92 : vector<8x8xf32>
    %94 = math.exp %93 : vector<8x8xf32>
    %cst_41 = arith.constant dense<0.000000e+00> : vector<8xf32>
    %95 = vector.multi_reduction <add>, %94, %cst_41 [1] : vector<8x8xf32> to vector<8xf32>
    %96 = vector.shape_cast %95 : vector<8xf32> to vector<8x1xf32>
    %97 = tpu.reciprocal %96 {approx = true} : vector<8x1xf32> -> vector<8x1xf32>
    %98 = vector.broadcast %97 : vector<8x1xf32> to vector<8x8xf32>
    %99 = arith.mulf %94, %98 : vector<8x8xf32>
    %cst_42 = arith.constant dense<0.000000e+00> : vector<8x8xf32>
    %100 = tpu.matmul %99, %84, %cst_42 {dimension_numbers = #tpu.dot_dimension_numbers<[1], [0], [0], [1], [0, 0, 1, 1], [], []>} : vector<8x8xf32>, vector<8x8xf32>, vector<8x8xf32> -> vector<8x8xf32>
    %101 = vector.extract_strided_slice %36 {offsets = [16, 0], sizes = [8, 32], strides = [1, 1]} : vector<32x32xf32> to vector<8x32xf32>
    %cst_43 = arith.constant dense<0.000000e+00> : vector<8x32xf32>
    %102 = tpu.matmul %100, %101, %cst_43 {dimension_numbers = #tpu.dot_dimension_numbers<[1], [0], [0], [1], [0, 0, 1, 1], [], []>} : vector<8x8xf32>, vector<8x32xf32>, vector<8x32xf32> -> vector<8x32xf32>
    %103 = arith.addf %81, %102 : vector<8x32xf32>
    %104 = vector.extract_strided_slice %34 {offsets = [0, 24], sizes = [8, 8], strides = [1, 1]} : vector<8x96xf32> to vector<8x8xf32>
    %105 = vector.extract_strided_slice %34 {offsets = [0, 56], sizes = [8, 8], strides = [1, 1]} : vector<8x96xf32> to vector<8x8xf32>
    %106 = vector.extract_strided_slice %34 {offsets = [0, 88], sizes = [8, 8], strides = [1, 1]} : vector<8x96xf32> to vector<8x8xf32>
    %cst_44 = arith.constant dense<0.000000e+00> : vector<8x8xf32>
    %107 = tpu.matmul %104, %105, %cst_44 {dimension_numbers = #tpu.dot_dimension_numbers<[1], [1], [0], [0], [0, 0, 1, 0], [], []>} : vector<8x8xf32>, vector<8x8xf32>, vector<8x8xf32> -> vector<8x8xf32>
    %cst_45 = arith.constant 0.353553385 : f32
    %108 = vector.broadcast %cst_45 : f32 to vector<8x8xf32>
    %109 = arith.mulf %107, %108 : vector<8x8xf32>
    %110 = vector.broadcast %3 : vector<1x8xf32> to vector<8x8xf32>
    %111 = arith.addf %109, %110 : vector<8x8xf32>
    %cst_46 = arith.constant dense<0xFF800000> : vector<8xf32>
    %112 = vector.multi_reduction <maximumf>, %111, %cst_46 [1] : vector<8x8xf32> to vector<8xf32>
    %113 = vector.shape_cast %112 : vector<8xf32> to vector<8x1xf32>
    %114 = vector.broadcast %113 : vector<8x1xf32> to vector<8x8xf32>
    %115 = arith.subf %111, %114 : vector<8x8xf32>
    %116 = math.exp %115 : vector<8x8xf32>
    %cst_47 = arith.constant dense<0.000000e+00> : vector<8xf32>
    %117 = vector.multi_reduction <add>, %116, %cst_47 [1] : vector<8x8xf32> to vector<8xf32>
    %118 = vector.shape_cast %117 : vector<8xf32> to vector<8x1xf32>
    %119 = tpu.reciprocal %118 {approx = true} : vector<8x1xf32> -> vector<8x1xf32>
    %120 = vector.broadcast %119 : vector<8x1xf32> to vector<8x8xf32>
    %121 = arith.mulf %116, %120 : vector<8x8xf32>
    %cst_48 = arith.constant dense<0.000000e+00> : vector<8x8xf32>
    %122 = tpu.matmul %121, %106, %cst_48 {dimension_numbers = #tpu.dot_dimension_numbers<[1], [0], [0], [1], [0, 0, 1, 1], [], []>} : vector<8x8xf32>, vector<8x8xf32>, vector<8x8xf32> -> vector<8x8xf32>
    %123 = vector.extract_strided_slice %36 {offsets = [24, 0], sizes = [8, 32], strides = [1, 1]} : vector<32x32xf32> to vector<8x32xf32>
    %cst_49 = arith.constant dense<0.000000e+00> : vector<8x32xf32>
    %124 = tpu.matmul %122, %123, %cst_49 {dimension_numbers = #tpu.dot_dimension_numbers<[1], [0], [0], [1], [0, 0, 1, 1], [], []>} : vector<8x8xf32>, vector<8x32xf32>, vector<8x32xf32> -> vector<8x32xf32>
    %125 = arith.addf %103, %124 : vector<8x32xf32>
    %c0_50 = arith.constant 0 : index
    %c0_51 = arith.constant 0 : index
    %c0_52 = arith.constant 0 : index
    %126 = vector.load %arg9[%c0_50, %c0_51, %c0_52] : memref<2x1x32xf32, #tpu.memory_space<vmem>>, vector<1x1x32xf32>
    %127 = vector.shape_cast %126 : vector<1x1x32xf32> to vector<1x32xf32>
    %128 = vector.broadcast %127 : vector<1x32xf32> to vector<8x32xf32>
    %129 = arith.addf %125, %128 : vector<8x32xf32>
    %130 = arith.addf %129, %27 : vector<8x32xf32>
    %c0_53 = arith.constant 0 : index
    %c0_54 = arith.constant 0 : index
    %c0_55 = arith.constant 0 : index
    %131 = vector.load %arg10[%c0_53, %c0_54, %c0_55] : memref<2x1x32xf32, #tpu.memory_space<vmem>>, vector<1x1x32xf32>
    %132 = vector.shape_cast %131 : vector<1x1x32xf32> to vector<1x32xf32>
    %c0_56 = arith.constant 0 : index
    %c0_57 = arith.constant 0 : index
    %c0_58 = arith.constant 0 : index
    %133 = vector.load %arg11[%c0_56, %c0_57, %c0_58] : memref<2x1x32xf32, #tpu.memory_space<vmem>>, vector<1x1x32xf32>
    %134 = vector.shape_cast %133 : vector<1x1x32xf32> to vector<1x32xf32>
    %cst_59 = arith.constant dense<0.000000e+00> : vector<8xf32>
    %135 = vector.multi_reduction <add>, %130, %cst_59 [1] : vector<8x32xf32> to vector<8xf32>
    %136 = vector.shape_cast %135 : vector<8xf32> to vector<8x1xf32>
    %cst_60 = arith.constant 3.200000e+01 : f32
    %137 = vector.broadcast %cst_60 : f32 to vector<8x1xf32>
    %138 = arith.divf %136, %137 : vector<8x1xf32>
    %139 = vector.broadcast %138 : vector<8x1xf32> to vector<8x32xf32>
    %140 = arith.subf %130, %139 : vector<8x32xf32>
    %141 = arith.mulf %140, %140 : vector<8x32xf32>
    %cst_61 = arith.constant dense<0.000000e+00> : vector<8xf32>
    %142 = vector.multi_reduction <add>, %141, %cst_61 [1] : vector<8x32xf32> to vector<8xf32>
    %143 = vector.shape_cast %142 : vector<8xf32> to vector<8x1xf32>
    %cst_62 = arith.constant 3.200000e+01 : f32
    %144 = vector.broadcast %cst_62 : f32 to vector<8x1xf32>
    %145 = arith.divf %143, %144 : vector<8x1xf32>
    %146 = vector.broadcast %138 : vector<8x1xf32> to vector<8x32xf32>
    %147 = arith.subf %130, %146 : vector<8x32xf32>
    %cst_63 = arith.constant 9.99999996E-13 : f32
    %148 = vector.broadcast %cst_63 : f32 to vector<8x1xf32>
    %149 = arith.addf %145, %148 : vector<8x1xf32>
    %150 = math.rsqrt %149 : vector<8x1xf32>
    %151 = vector.broadcast %150 : vector<8x1xf32> to vector<8x32xf32>
    %152 = arith.mulf %147, %151 : vector<8x32xf32>
    %153 = vector.broadcast %132 : vector<1x32xf32> to vector<8x32xf32>
    %154 = arith.mulf %152, %153 : vector<8x32xf32>
    %155 = vector.broadcast %134 : vector<1x32xf32> to vector<8x32xf32>
    %156 = arith.addf %154, %155 : vector<8x32xf32>
    %c0_64 = arith.constant 0 : index
    %c0_65 = arith.constant 0 : index
    %c0_66 = arith.constant 0 : index
    %157 = vector.load %arg12[%c0_64, %c0_65, %c0_66] : memref<2x32x64xf32, #tpu.memory_space<vmem>>, vector<1x32x64xf32>
    %158 = vector.shape_cast %157 : vector<1x32x64xf32> to vector<32x64xf32>
    %cst_67 = arith.constant dense<0.000000e+00> : vector<8x64xf32>
    %159 = tpu.matmul %156, %158, %cst_67 {dimension_numbers = #tpu.dot_dimension_numbers<[1], [0], [0], [1], [0, 0, 1, 1], [], []>} : vector<8x32xf32>, vector<32x64xf32>, vector<8x64xf32> -> vector<8x64xf32>
    %c0_68 = arith.constant 0 : index
    %c0_69 = arith.constant 0 : index
    %c0_70 = arith.constant 0 : index
    %160 = vector.load %arg13[%c0_68, %c0_69, %c0_70] : memref<2x1x64xf32, #tpu.memory_space<vmem>>, vector<1x1x64xf32>
    %161 = vector.shape_cast %160 : vector<1x1x64xf32> to vector<1x64xf32>
    %162 = vector.broadcast %161 : vector<1x64xf32> to vector<8x64xf32>
    %163 = arith.addf %159, %162 : vector<8x64xf32>
    %164 = arith.mulf %163, %163 : vector<8x64xf32>
    %165 = arith.mulf %163, %164 : vector<8x64xf32>
    %cst_71 = arith.constant 4.471500e-02 : f32
    %166 = vector.broadcast %cst_71 : f32 to vector<8x64xf32>
    %167 = arith.mulf %166, %165 : vector<8x64xf32>
    %168 = arith.addf %163, %167 : vector<8x64xf32>
    %cst_72 = arith.constant 0.797884583 : f32
    %169 = vector.broadcast %cst_72 : f32 to vector<8x64xf32>
    %170 = arith.mulf %169, %168 : vector<8x64xf32>
    %171 = math.tanh %170 : vector<8x64xf32>
    %cst_73 = arith.constant 1.000000e+00 : f32
    %172 = vector.broadcast %cst_73 : f32 to vector<8x64xf32>
    %173 = arith.addf %172, %171 : vector<8x64xf32>
    %cst_74 = arith.constant 5.000000e-01 : f32
    %174 = vector.broadcast %cst_74 : f32 to vector<8x64xf32>
    %175 = arith.mulf %174, %173 : vector<8x64xf32>
    %176 = arith.mulf %163, %175 : vector<8x64xf32>
    %c0_75 = arith.constant 0 : index
    %c0_76 = arith.constant 0 : index
    %c0_77 = arith.constant 0 : index
    %177 = vector.load %arg14[%c0_75, %c0_76, %c0_77] : memref<2x64x32xf32, #tpu.memory_space<vmem>>, vector<1x64x32xf32>
    %178 = vector.shape_cast %177 : vector<1x64x32xf32> to vector<64x32xf32>
    %cst_78 = arith.constant dense<0.000000e+00> : vector<8x32xf32>
    %179 = tpu.matmul %176, %178, %cst_78 {dimension_numbers = #tpu.dot_dimension_numbers<[1], [0], [0], [1], [0, 0, 1, 1], [], []>} : vector<8x64xf32>, vector<64x32xf32>, vector<8x32xf32> -> vector<8x32xf32>
    %c0_79 = arith.constant 0 : index
    %c0_80 = arith.constant 0 : index
    %c0_81 = arith.constant 0 : index
    %180 = vector.load %arg15[%c0_79, %c0_80, %c0_81] : memref<2x1x32xf32, #tpu.memory_space<vmem>>, vector<1x1x32xf32>
    %181 = vector.shape_cast %180 : vector<1x1x32xf32> to vector<1x32xf32>
    %182 = vector.broadcast %181 : vector<1x32xf32> to vector<8x32xf32>
    %183 = arith.addf %179, %182 : vector<8x32xf32>
    %184 = arith.addf %183, %156 : vector<8x32xf32>
    %c0_82 = arith.constant 0 : index
    %c0_83 = arith.constant 0 : index
    %c0_84 = arith.constant 0 : index
    %185 = vector.load %arg16[%c0_82, %c0_83, %c0_84] : memref<2x1x32xf32, #tpu.memory_space<vmem>>, vector<1x1x32xf32>
    %186 = vector.shape_cast %185 : vector<1x1x32xf32> to vector<1x32xf32>
    %c0_85 = arith.constant 0 : index
    %c0_86 = arith.constant 0 : index
    %c0_87 = arith.constant 0 : index
    %187 = vector.load %arg17[%c0_85, %c0_86, %c0_87] : memref<2x1x32xf32, #tpu.memory_space<vmem>>, vector<1x1x32xf32>
    %188 = vector.shape_cast %187 : vector<1x1x32xf32> to vector<1x32xf32>
    %cst_88 = arith.constant dense<0.000000e+00> : vector<8xf32>
    %189 = vector.multi_reduction <add>, %184, %cst_88 [1] : vector<8x32xf32> to vector<8xf32>
    %190 = vector.shape_cast %189 : vector<8xf32> to vector<8x1xf32>
    %cst_89 = arith.constant 3.200000e+01 : f32
    %191 = vector.broadcast %cst_89 : f32 to vector<8x1xf32>
    %192 = arith.divf %190, %191 : vector<8x1xf32>
    %193 = vector.broadcast %192 : vector<8x1xf32> to vector<8x32xf32>
    %194 = arith.subf %184, %193 : vector<8x32xf32>
    %195 = arith.mulf %194, %194 : vector<8x32xf32>
    %cst_90 = arith.constant dense<0.000000e+00> : vector<8xf32>
    %196 = vector.multi_reduction <add>, %195, %cst_90 [1] : vector<8x32xf32> to vector<8xf32>
    %197 = vector.shape_cast %196 : vector<8xf32> to vector<8x1xf32>
    %cst_91 = arith.constant 3.200000e+01 : f32
    %198 = vector.broadcast %cst_91 : f32 to vector<8x1xf32>
    %199 = arith.divf %197, %198 : vector<8x1xf32>
    %200 = vector.broadcast %192 : vector<8x1xf32> to vector<8x32xf32>
    %201 = arith.subf %184, %200 : vector<8x32xf32>
    %cst_92 = arith.constant 9.99999996E-13 : f32
    %202 = vector.broadcast %cst_92 : f32 to vector<8x1xf32>
    %203 = arith.addf %199, %202 : vector<8x1xf32>
    %204 = math.rsqrt %203 : vector<8x1xf32>
    %205 = vector.broadcast %204 : vector<8x1xf32> to vector<8x32xf32>
    %206 = arith.mulf %201, %205 : vector<8x32xf32>
    %207 = vector.broadcast %186 : vector<1x32xf32> to vector<8x32xf32>
    %208 = arith.mulf %206, %207 : vector<8x32xf32>
    %209 = vector.broadcast %188 : vector<1x32xf32> to vector<8x32xf32>
    %210 = arith.addf %208, %209 : vector<8x32xf32>
    %c1 = arith.constant 1 : index
    %c0_93 = arith.constant 0 : index
    %c0_94 = arith.constant 0 : index
    %211 = vector.load %arg6[%c1, %c0_93, %c0_94] : memref<2x32x96xf32, #tpu.memory_space<vmem>>, vector<1x32x96xf32>
    %212 = vector.shape_cast %211 : vector<1x32x96xf32> to vector<32x96xf32>
    %cst_95 = arith.constant dense<0.000000e+00> : vector<8x96xf32>
    %213 = tpu.matmul %210, %212, %cst_95 {dimension_numbers = #tpu.dot_dimension_numbers<[1], [0], [0], [1], [0, 0, 1, 1], [], []>} : vector<8x32xf32>, vector<32x96xf32>, vector<8x96xf32> -> vector<8x96xf32>
    %c1_96 = arith.constant 1 : index
    %c0_97 = arith.constant 0 : index
    %c0_98 = arith.constant 0 : index
    %214 = vector.load %arg7[%c1_96, %c0_97, %c0_98] : memref<2x1x96xf32, #tpu.memory_space<vmem>>, vector<1x1x96xf32>
    %215 = vector.shape_cast %214 : vector<1x1x96xf32> to vector<1x96xf32>
    %216 = vector.broadcast %215 : vector<1x96xf32> to vector<8x96xf32>
    %217 = arith.addf %213, %216 : vector<8x96xf32>
    %c1_99 = arith.constant 1 : index
    %c0_100 = arith.constant 0 : index
    %c0_101 = arith.constant 0 : index
    %218 = vector.load %arg8[%c1_99, %c0_100, %c0_101] : memref<2x32x32xf32, #tpu.memory_space<vmem>>, vector<1x32x32xf32>
    %219 = vector.shape_cast %218 : vector<1x32x32xf32> to vector<32x32xf32>
    %cst_102 = arith.constant 0.000000e+00 : f32
    %220 = vector.broadcast %cst_102 : f32 to vector<8x32xf32>
    %221 = vector.extract_strided_slice %217 {offsets = [0, 0], sizes = [8, 8], strides = [1, 1]} : vector<8x96xf32> to vector<8x8xf32>
    %222 = vector.extract_strided_slice %217 {offsets = [0, 32], sizes = [8, 8], strides = [1, 1]} : vector<8x96xf32> to vector<8x8xf32>
    %223 = vector.extract_strided_slice %217 {offsets = [0, 64], sizes = [8, 8], strides = [1, 1]} : vector<8x96xf32> to vector<8x8xf32>
    %cst_103 = arith.constant dense<0.000000e+00> : vector<8x8xf32>
    %224 = tpu.matmul %221, %222, %cst_103 {dimension_numbers = #tpu.dot_dimension_numbers<[1], [1], [0], [0], [0, 0, 1, 0], [], []>} : vector<8x8xf32>, vector<8x8xf32>, vector<8x8xf32> -> vector<8x8xf32>
    %cst_104 = arith.constant 0.353553385 : f32
    %225 = vector.broadcast %cst_104 : f32 to vector<8x8xf32>
    %226 = arith.mulf %224, %225 : vector<8x8xf32>
    %227 = vector.broadcast %3 : vector<1x8xf32> to vector<8x8xf32>
    %228 = arith.addf %226, %227 : vector<8x8xf32>
    %cst_105 = arith.constant dense<0xFF800000> : vector<8xf32>
    %229 = vector.multi_reduction <maximumf>, %228, %cst_105 [1] : vector<8x8xf32> to vector<8xf32>
    %230 = vector.shape_cast %229 : vector<8xf32> to vector<8x1xf32>
    %231 = vector.broadcast %230 : vector<8x1xf32> to vector<8x8xf32>
    %232 = arith.subf %228, %231 : vector<8x8xf32>
    %233 = math.exp %232 : vector<8x8xf32>
    %cst_106 = arith.constant dense<0.000000e+00> : vector<8xf32>
    %234 = vector.multi_reduction <add>, %233, %cst_106 [1] : vector<8x8xf32> to vector<8xf32>
    %235 = vector.shape_cast %234 : vector<8xf32> to vector<8x1xf32>
    %236 = tpu.reciprocal %235 {approx = true} : vector<8x1xf32> -> vector<8x1xf32>
    %237 = vector.broadcast %236 : vector<8x1xf32> to vector<8x8xf32>
    %238 = arith.mulf %233, %237 : vector<8x8xf32>
    %cst_107 = arith.constant dense<0.000000e+00> : vector<8x8xf32>
    %239 = tpu.matmul %238, %223, %cst_107 {dimension_numbers = #tpu.dot_dimension_numbers<[1], [0], [0], [1], [0, 0, 1, 1], [], []>} : vector<8x8xf32>, vector<8x8xf32>, vector<8x8xf32> -> vector<8x8xf32>
    %240 = vector.extract_strided_slice %219 {offsets = [0, 0], sizes = [8, 32], strides = [1, 1]} : vector<32x32xf32> to vector<8x32xf32>
    %cst_108 = arith.constant dense<0.000000e+00> : vector<8x32xf32>
    %241 = tpu.matmul %239, %240, %cst_108 {dimension_numbers = #tpu.dot_dimension_numbers<[1], [0], [0], [1], [0, 0, 1, 1], [], []>} : vector<8x8xf32>, vector<8x32xf32>, vector<8x32xf32> -> vector<8x32xf32>
    %242 = arith.addf %220, %241 : vector<8x32xf32>
    %243 = vector.extract_strided_slice %217 {offsets = [0, 8], sizes = [8, 8], strides = [1, 1]} : vector<8x96xf32> to vector<8x8xf32>
    %244 = vector.extract_strided_slice %217 {offsets = [0, 40], sizes = [8, 8], strides = [1, 1]} : vector<8x96xf32> to vector<8x8xf32>
    %245 = vector.extract_strided_slice %217 {offsets = [0, 72], sizes = [8, 8], strides = [1, 1]} : vector<8x96xf32> to vector<8x8xf32>
    %cst_109 = arith.constant dense<0.000000e+00> : vector<8x8xf32>
    %246 = tpu.matmul %243, %244, %cst_109 {dimension_numbers = #tpu.dot_dimension_numbers<[1], [1], [0], [0], [0, 0, 1, 0], [], []>} : vector<8x8xf32>, vector<8x8xf32>, vector<8x8xf32> -> vector<8x8xf32>
    %cst_110 = arith.constant 0.353553385 : f32
    %247 = vector.broadcast %cst_110 : f32 to vector<8x8xf32>
    %248 = arith.mulf %246, %247 : vector<8x8xf32>
    %249 = vector.broadcast %3 : vector<1x8xf32> to vector<8x8xf32>
    %250 = arith.addf %248, %249 : vector<8x8xf32>
    %cst_111 = arith.constant dense<0xFF800000> : vector<8xf32>
    %251 = vector.multi_reduction <maximumf>, %250, %cst_111 [1] : vector<8x8xf32> to vector<8xf32>
    %252 = vector.shape_cast %251 : vector<8xf32> to vector<8x1xf32>
    %253 = vector.broadcast %252 : vector<8x1xf32> to vector<8x8xf32>
    %254 = arith.subf %250, %253 : vector<8x8xf32>
    %255 = math.exp %254 : vector<8x8xf32>
    %cst_112 = arith.constant dense<0.000000e+00> : vector<8xf32>
    %256 = vector.multi_reduction <add>, %255, %cst_112 [1] : vector<8x8xf32> to vector<8xf32>
    %257 = vector.shape_cast %256 : vector<8xf32> to vector<8x1xf32>
    %258 = tpu.reciprocal %257 {approx = true} : vector<8x1xf32> -> vector<8x1xf32>
    %259 = vector.broadcast %258 : vector<8x1xf32> to vector<8x8xf32>
    %260 = arith.mulf %255, %259 : vector<8x8xf32>
    %cst_113 = arith.constant dense<0.000000e+00> : vector<8x8xf32>
    %261 = tpu.matmul %260, %245, %cst_113 {dimension_numbers = #tpu.dot_dimension_numbers<[1], [0], [0], [1], [0, 0, 1, 1], [], []>} : vector<8x8xf32>, vector<8x8xf32>, vector<8x8xf32> -> vector<8x8xf32>
    %262 = vector.extract_strided_slice %219 {offsets = [8, 0], sizes = [8, 32], strides = [1, 1]} : vector<32x32xf32> to vector<8x32xf32>
    %cst_114 = arith.constant dense<0.000000e+00> : vector<8x32xf32>
    %263 = tpu.matmul %261, %262, %cst_114 {dimension_numbers = #tpu.dot_dimension_numbers<[1], [0], [0], [1], [0, 0, 1, 1], [], []>} : vector<8x8xf32>, vector<8x32xf32>, vector<8x32xf32> -> vector<8x32xf32>
    %264 = arith.addf %242, %263 : vector<8x32xf32>
    %265 = vector.extract_strided_slice %217 {offsets = [0, 16], sizes = [8, 8], strides = [1, 1]} : vector<8x96xf32> to vector<8x8xf32>
    %266 = vector.extract_strided_slice %217 {offsets = [0, 48], sizes = [8, 8], strides = [1, 1]} : vector<8x96xf32> to vector<8x8xf32>
    %267 = vector.extract_strided_slice %217 {offsets = [0, 80], sizes = [8, 8], strides = [1, 1]} : vector<8x96xf32> to vector<8x8xf32>
    %cst_115 = arith.constant dense<0.000000e+00> : vector<8x8xf32>
    %268 = tpu.matmul %265, %266, %cst_115 {dimension_numbers = #tpu.dot_dimension_numbers<[1], [1], [0], [0], [0, 0, 1, 0], [], []>} : vector<8x8xf32>, vector<8x8xf32>, vector<8x8xf32> -> vector<8x8xf32>
    %cst_116 = arith.constant 0.353553385 : f32
    %269 = vector.broadcast %cst_116 : f32 to vector<8x8xf32>
    %270 = arith.mulf %268, %269 : vector<8x8xf32>
    %271 = vector.broadcast %3 : vector<1x8xf32> to vector<8x8xf32>
    %272 = arith.addf %270, %271 : vector<8x8xf32>
    %cst_117 = arith.constant dense<0xFF800000> : vector<8xf32>
    %273 = vector.multi_reduction <maximumf>, %272, %cst_117 [1] : vector<8x8xf32> to vector<8xf32>
    %274 = vector.shape_cast %273 : vector<8xf32> to vector<8x1xf32>
    %275 = vector.broadcast %274 : vector<8x1xf32> to vector<8x8xf32>
    %276 = arith.subf %272, %275 : vector<8x8xf32>
    %277 = math.exp %276 : vector<8x8xf32>
    %cst_118 = arith.constant dense<0.000000e+00> : vector<8xf32>
    %278 = vector.multi_reduction <add>, %277, %cst_118 [1] : vector<8x8xf32> to vector<8xf32>
    %279 = vector.shape_cast %278 : vector<8xf32> to vector<8x1xf32>
    %280 = tpu.reciprocal %279 {approx = true} : vector<8x1xf32> -> vector<8x1xf32>
    %281 = vector.broadcast %280 : vector<8x1xf32> to vector<8x8xf32>
    %282 = arith.mulf %277, %281 : vector<8x8xf32>
    %cst_119 = arith.constant dense<0.000000e+00> : vector<8x8xf32>
    %283 = tpu.matmul %282, %267, %cst_119 {dimension_numbers = #tpu.dot_dimension_numbers<[1], [0], [0], [1], [0, 0, 1, 1], [], []>} : vector<8x8xf32>, vector<8x8xf32>, vector<8x8xf32> -> vector<8x8xf32>
    %284 = vector.extract_strided_slice %219 {offsets = [16, 0], sizes = [8, 32], strides = [1, 1]} : vector<32x32xf32> to vector<8x32xf32>
    %cst_120 = arith.constant dense<0.000000e+00> : vector<8x32xf32>
    %285 = tpu.matmul %283, %284, %cst_120 {dimension_numbers = #tpu.dot_dimension_numbers<[1], [0], [0], [1], [0, 0, 1, 1], [], []>} : vector<8x8xf32>, vector<8x32xf32>, vector<8x32xf32> -> vector<8x32xf32>
    %286 = arith.addf %264, %285 : vector<8x32xf32>
    %287 = vector.extract_strided_slice %217 {offsets = [0, 24], sizes = [8, 8], strides = [1, 1]} : vector<8x96xf32> to vector<8x8xf32>
    %288 = vector.extract_strided_slice %217 {offsets = [0, 56], sizes = [8, 8], strides = [1, 1]} : vector<8x96xf32> to vector<8x8xf32>
    %289 = vector.extract_strided_slice %217 {offsets = [0, 88], sizes = [8, 8], strides = [1, 1]} : vector<8x96xf32> to vector<8x8xf32>
    %cst_121 = arith.constant dense<0.000000e+00> : vector<8x8xf32>
    %290 = tpu.matmul %287, %288, %cst_121 {dimension_numbers = #tpu.dot_dimension_numbers<[1], [1], [0], [0], [0, 0, 1, 0], [], []>} : vector<8x8xf32>, vector<8x8xf32>, vector<8x8xf32> -> vector<8x8xf32>
    %cst_122 = arith.constant 0.353553385 : f32
    %291 = vector.broadcast %cst_122 : f32 to vector<8x8xf32>
    %292 = arith.mulf %290, %291 : vector<8x8xf32>
    %293 = vector.broadcast %3 : vector<1x8xf32> to vector<8x8xf32>
    %294 = arith.addf %292, %293 : vector<8x8xf32>
    %cst_123 = arith.constant dense<0xFF800000> : vector<8xf32>
    %295 = vector.multi_reduction <maximumf>, %294, %cst_123 [1] : vector<8x8xf32> to vector<8xf32>
    %296 = vector.shape_cast %295 : vector<8xf32> to vector<8x1xf32>
    %297 = vector.broadcast %296 : vector<8x1xf32> to vector<8x8xf32>
    %298 = arith.subf %294, %297 : vector<8x8xf32>
    %299 = math.exp %298 : vector<8x8xf32>
    %cst_124 = arith.constant dense<0.000000e+00> : vector<8xf32>
    %300 = vector.multi_reduction <add>, %299, %cst_124 [1] : vector<8x8xf32> to vector<8xf32>
    %301 = vector.shape_cast %300 : vector<8xf32> to vector<8x1xf32>
    %302 = tpu.reciprocal %301 {approx = true} : vector<8x1xf32> -> vector<8x1xf32>
    %303 = vector.broadcast %302 : vector<8x1xf32> to vector<8x8xf32>
    %304 = arith.mulf %299, %303 : vector<8x8xf32>
    %cst_125 = arith.constant dense<0.000000e+00> : vector<8x8xf32>
    %305 = tpu.matmul %304, %289, %cst_125 {dimension_numbers = #tpu.dot_dimension_numbers<[1], [0], [0], [1], [0, 0, 1, 1], [], []>} : vector<8x8xf32>, vector<8x8xf32>, vector<8x8xf32> -> vector<8x8xf32>
    %306 = vector.extract_strided_slice %219 {offsets = [24, 0], sizes = [8, 32], strides = [1, 1]} : vector<32x32xf32> to vector<8x32xf32>
    %cst_126 = arith.constant dense<0.000000e+00> : vector<8x32xf32>
    %307 = tpu.matmul %305, %306, %cst_126 {dimension_numbers = #tpu.dot_dimension_numbers<[1], [0], [0], [1], [0, 0, 1, 1], [], []>} : vector<8x8xf32>, vector<8x32xf32>, vector<8x32xf32> -> vector<8x32xf32>
    %308 = arith.addf %286, %307 : vector<8x32xf32>
    %c1_127 = arith.constant 1 : index
    %c0_128 = arith.constant 0 : index
    %c0_129 = arith.constant 0 : index
    %309 = vector.load %arg9[%c1_127, %c0_128, %c0_129] : memref<2x1x32xf32, #tpu.memory_space<vmem>>, vector<1x1x32xf32>
    %310 = vector.shape_cast %309 : vector<1x1x32xf32> to vector<1x32xf32>
    %311 = vector.broadcast %310 : vector<1x32xf32> to vector<8x32xf32>
    %312 = arith.addf %308, %311 : vector<8x32xf32>
    %313 = arith.addf %312, %210 : vector<8x32xf32>
    %c1_130 = arith.constant 1 : index
    %c0_131 = arith.constant 0 : index
    %c0_132 = arith.constant 0 : index
    %314 = vector.load %arg10[%c1_130, %c0_131, %c0_132] : memref<2x1x32xf32, #tpu.memory_space<vmem>>, vector<1x1x32xf32>
    %315 = vector.shape_cast %314 : vector<1x1x32xf32> to vector<1x32xf32>
    %c1_133 = arith.constant 1 : index
    %c0_134 = arith.constant 0 : index
    %c0_135 = arith.constant 0 : index
    %316 = vector.load %arg11[%c1_133, %c0_134, %c0_135] : memref<2x1x32xf32, #tpu.memory_space<vmem>>, vector<1x1x32xf32>
    %317 = vector.shape_cast %316 : vector<1x1x32xf32> to vector<1x32xf32>
    %cst_136 = arith.constant dense<0.000000e+00> : vector<8xf32>
    %318 = vector.multi_reduction <add>, %313, %cst_136 [1] : vector<8x32xf32> to vector<8xf32>
    %319 = vector.shape_cast %318 : vector<8xf32> to vector<8x1xf32>
    %cst_137 = arith.constant 3.200000e+01 : f32
    %320 = vector.broadcast %cst_137 : f32 to vector<8x1xf32>
    %321 = arith.divf %319, %320 : vector<8x1xf32>
    %322 = vector.broadcast %321 : vector<8x1xf32> to vector<8x32xf32>
    %323 = arith.subf %313, %322 : vector<8x32xf32>
    %324 = arith.mulf %323, %323 : vector<8x32xf32>
    %cst_138 = arith.constant dense<0.000000e+00> : vector<8xf32>
    %325 = vector.multi_reduction <add>, %324, %cst_138 [1] : vector<8x32xf32> to vector<8xf32>
    %326 = vector.shape_cast %325 : vector<8xf32> to vector<8x1xf32>
    %cst_139 = arith.constant 3.200000e+01 : f32
    %327 = vector.broadcast %cst_139 : f32 to vector<8x1xf32>
    %328 = arith.divf %326, %327 : vector<8x1xf32>
    %329 = vector.broadcast %321 : vector<8x1xf32> to vector<8x32xf32>
    %330 = arith.subf %313, %329 : vector<8x32xf32>
    %cst_140 = arith.constant 9.99999996E-13 : f32
    %331 = vector.broadcast %cst_140 : f32 to vector<8x1xf32>
    %332 = arith.addf %328, %331 : vector<8x1xf32>
    %333 = math.rsqrt %332 : vector<8x1xf32>
    %334 = vector.broadcast %333 : vector<8x1xf32> to vector<8x32xf32>
    %335 = arith.mulf %330, %334 : vector<8x32xf32>
    %336 = vector.broadcast %315 : vector<1x32xf32> to vector<8x32xf32>
    %337 = arith.mulf %335, %336 : vector<8x32xf32>
    %338 = vector.broadcast %317 : vector<1x32xf32> to vector<8x32xf32>
    %339 = arith.addf %337, %338 : vector<8x32xf32>
    %c1_141 = arith.constant 1 : index
    %c0_142 = arith.constant 0 : index
    %c0_143 = arith.constant 0 : index
    %340 = vector.load %arg12[%c1_141, %c0_142, %c0_143] : memref<2x32x64xf32, #tpu.memory_space<vmem>>, vector<1x32x64xf32>
    %341 = vector.shape_cast %340 : vector<1x32x64xf32> to vector<32x64xf32>
    %cst_144 = arith.constant dense<0.000000e+00> : vector<8x64xf32>
    %342 = tpu.matmul %339, %341, %cst_144 {dimension_numbers = #tpu.dot_dimension_numbers<[1], [0], [0], [1], [0, 0, 1, 1], [], []>} : vector<8x32xf32>, vector<32x64xf32>, vector<8x64xf32> -> vector<8x64xf32>
    %c1_145 = arith.constant 1 : index
    %c0_146 = arith.constant 0 : index
    %c0_147 = arith.constant 0 : index
    %343 = vector.load %arg13[%c1_145, %c0_146, %c0_147] : memref<2x1x64xf32, #tpu.memory_space<vmem>>, vector<1x1x64xf32>
    %344 = vector.shape_cast %343 : vector<1x1x64xf32> to vector<1x64xf32>
    %345 = vector.broadcast %344 : vector<1x64xf32> to vector<8x64xf32>
    %346 = arith.addf %342, %345 : vector<8x64xf32>
    %347 = arith.mulf %346, %346 : vector<8x64xf32>
    %348 = arith.mulf %346, %347 : vector<8x64xf32>
    %cst_148 = arith.constant 4.471500e-02 : f32
    %349 = vector.broadcast %cst_148 : f32 to vector<8x64xf32>
    %350 = arith.mulf %349, %348 : vector<8x64xf32>
    %351 = arith.addf %346, %350 : vector<8x64xf32>
    %cst_149 = arith.constant 0.797884583 : f32
    %352 = vector.broadcast %cst_149 : f32 to vector<8x64xf32>
    %353 = arith.mulf %352, %351 : vector<8x64xf32>
    %354 = math.tanh %353 : vector<8x64xf32>
    %cst_150 = arith.constant 1.000000e+00 : f32
    %355 = vector.broadcast %cst_150 : f32 to vector<8x64xf32>
    %356 = arith.addf %355, %354 : vector<8x64xf32>
    %cst_151 = arith.constant 5.000000e-01 : f32
    %357 = vector.broadcast %cst_151 : f32 to vector<8x64xf32>
    %358 = arith.mulf %357, %356 : vector<8x64xf32>
    %359 = arith.mulf %346, %358 : vector<8x64xf32>
    %c1_152 = arith.constant 1 : index
    %c0_153 = arith.constant 0 : index
    %c0_154 = arith.constant 0 : index
    %360 = vector.load %arg14[%c1_152, %c0_153, %c0_154] : memref<2x64x32xf32, #tpu.memory_space<vmem>>, vector<1x64x32xf32>
    %361 = vector.shape_cast %360 : vector<1x64x32xf32> to vector<64x32xf32>
    %cst_155 = arith.constant dense<0.000000e+00> : vector<8x32xf32>
    %362 = tpu.matmul %359, %361, %cst_155 {dimension_numbers = #tpu.dot_dimension_numbers<[1], [0], [0], [1], [0, 0, 1, 1], [], []>} : vector<8x64xf32>, vector<64x32xf32>, vector<8x32xf32> -> vector<8x32xf32>
    %c1_156 = arith.constant 1 : index
    %c0_157 = arith.constant 0 : index
    %c0_158 = arith.constant 0 : index
    %363 = vector.load %arg15[%c1_156, %c0_157, %c0_158] : memref<2x1x32xf32, #tpu.memory_space<vmem>>, vector<1x1x32xf32>
    %364 = vector.shape_cast %363 : vector<1x1x32xf32> to vector<1x32xf32>
    %365 = vector.broadcast %364 : vector<1x32xf32> to vector<8x32xf32>
    %366 = arith.addf %362, %365 : vector<8x32xf32>
    %367 = arith.addf %366, %339 : vector<8x32xf32>
    %c1_159 = arith.constant 1 : index
    %c0_160 = arith.constant 0 : index
    %c0_161 = arith.constant 0 : index
    %368 = vector.load %arg16[%c1_159, %c0_160, %c0_161] : memref<2x1x32xf32, #tpu.memory_space<vmem>>, vector<1x1x32xf32>
    %369 = vector.shape_cast %368 : vector<1x1x32xf32> to vector<1x32xf32>
    %c1_162 = arith.constant 1 : index
    %c0_163 = arith.constant 0 : index
    %c0_164 = arith.constant 0 : index
    %370 = vector.load %arg17[%c1_162, %c0_163, %c0_164] : memref<2x1x32xf32, #tpu.memory_space<vmem>>, vector<1x1x32xf32>
    %371 = vector.shape_cast %370 : vector<1x1x32xf32> to vector<1x32xf32>
    %cst_165 = arith.constant dense<0.000000e+00> : vector<8xf32>
    %372 = vector.multi_reduction <add>, %367, %cst_165 [1] : vector<8x32xf32> to vector<8xf32>
    %373 = vector.shape_cast %372 : vector<8xf32> to vector<8x1xf32>
    %cst_166 = arith.constant 3.200000e+01 : f32
    %374 = vector.broadcast %cst_166 : f32 to vector<8x1xf32>
    %375 = arith.divf %373, %374 : vector<8x1xf32>
    %376 = vector.broadcast %375 : vector<8x1xf32> to vector<8x32xf32>
    %377 = arith.subf %367, %376 : vector<8x32xf32>
    %378 = arith.mulf %377, %377 : vector<8x32xf32>
    %cst_167 = arith.constant dense<0.000000e+00> : vector<8xf32>
    %379 = vector.multi_reduction <add>, %378, %cst_167 [1] : vector<8x32xf32> to vector<8xf32>
    %380 = vector.shape_cast %379 : vector<8xf32> to vector<8x1xf32>
    %cst_168 = arith.constant 3.200000e+01 : f32
    %381 = vector.broadcast %cst_168 : f32 to vector<8x1xf32>
    %382 = arith.divf %380, %381 : vector<8x1xf32>
    %383 = vector.broadcast %375 : vector<8x1xf32> to vector<8x32xf32>
    %384 = arith.subf %367, %383 : vector<8x32xf32>
    %cst_169 = arith.constant 9.99999996E-13 : f32
    %385 = vector.broadcast %cst_169 : f32 to vector<8x1xf32>
    %386 = arith.addf %382, %385 : vector<8x1xf32>
    %387 = math.rsqrt %386 : vector<8x1xf32>
    %388 = vector.broadcast %387 : vector<8x1xf32> to vector<8x32xf32>
    %389 = arith.mulf %384, %388 : vector<8x32xf32>
    %390 = vector.broadcast %369 : vector<1x32xf32> to vector<8x32xf32>
    %391 = arith.mulf %389, %390 : vector<8x32xf32>
    %392 = vector.broadcast %371 : vector<1x32xf32> to vector<8x32xf32>
    %393 = arith.addf %391, %392 : vector<8x32xf32>
    %394 = vector.extract_strided_slice %393 {offsets = [0, 0], sizes = [1, 32], strides = [1, 1]} : vector<8x32xf32> to vector<1x32xf32>
    %c0_170 = arith.constant 0 : index
    %c0_171 = arith.constant 0 : index
    %395 = vector.load %arg18[%c0_170, %c0_171] : memref<32x32xf32, #tpu.memory_space<vmem>>, vector<32x32xf32>
    %cst_172 = arith.constant dense<0.000000e+00> : vector<1x32xf32>
    %396 = tpu.matmul %394, %395, %cst_172 {dimension_numbers = #tpu.dot_dimension_numbers<[1], [0], [0], [1], [0, 0, 1, 1], [], []>} : vector<1x32xf32>, vector<32x32xf32>, vector<1x32xf32> -> vector<1x32xf32>
    %c0_173 = arith.constant 0 : index
    %c0_174 = arith.constant 0 : index
    %397 = vector.load %arg19[%c0_173, %c0_174] : memref<1x32xf32, #tpu.memory_space<vmem>>, vector<1x32xf32>
    %398 = arith.addf %396, %397 : vector<1x32xf32>
    %399 = math.tanh %398 : vector<1x32xf32>
    %c0_175 = arith.constant 0 : index
    %c0_176 = arith.constant 0 : index
    %c0_177 = arith.constant 0 : index
    %c0_178 = arith.constant 0 : index
    %400 = vector.load %arg20[%c0_175, %c0_176, %c0_177, %c0_178] : memref<1x1x1x32xf32, #tpu.memory_space<vmem>>, vector<1x1x1x32xf32>
    %401 = vector.shape_cast %400 : vector<1x1x1x32xf32> to vector<1x32xf32>
    %402 = vector.shape_cast %399 : vector<1x32xf32> to vector<1x1x1x32xf32>
    tpu.vector_store %arg20[%c0_175, %c0_176, %c0_177, %c0_178], %402 {strides = array<i32>} : memref<1x1x1x32xf32, #tpu.memory_space<vmem>>, vector<1x1x1x32xf32>,
    return
  }
  func.func @transform_0(%arg0: i32, %arg1: i32) -> (i32, i32, i32, i32) {
    %c0_i32 = arith.constant 0 : i32
    %c0_i32_0 = arith.constant 0 : i32
    %c0_i32_1 = arith.constant 0 : i32
    return %arg0, %arg1, %c0_i32, %c0_i32_0 : i32, i32, i32, i32
  }
  func.func @transform_1(%arg0: i32, %arg1: i32) -> (i32, i32, i32, i32) {
    %c0_i32 = arith.constant 0 : i32
    %c0_i32_0 = arith.constant 0 : i32
    %c0_i32_1 = arith.constant 0 : i32
    return %arg0, %arg1, %c0_i32, %c0_i32_0 : i32, i32, i32, i32
  }
  func.func @transform_2(%arg0: i32, %arg1: i32) -> (i32, i32) {
    %c0_i32 = arith.constant 0 : i32
    %c0_i32_0 = arith.constant 0 : i32
    %c0_i32_1 = arith.constant 0 : i32
    return %c0_i32, %c0_i32_0 : i32, i32
  }
  func.func @transform_3(%arg0: i32, %arg1: i32) -> (i32, i32) {
    %c0_i32 = arith.constant 0 : i32
    %c0_i32_0 = arith.constant 0 : i32
    %c0_i32_1 = arith.constant 0 : i32
    return %c0_i32, %c0_i32_0 : i32, i32
  }
  func.func @transform_4(%arg0: i32, %arg1: i32) -> (i32, i32, i32) {
    %c0_i32 = arith.constant 0 : i32
    %c0_i32_0 = arith.constant 0 : i32
    %c0_i32_1 = arith.constant 0 : i32
    %c0_i32_2 = arith.constant 0 : i32
    return %c0_i32, %c0_i32_0, %c0_i32_1 : i32, i32, i32
  }
  func.func @transform_5(%arg0: i32, %arg1: i32) -> (i32, i32, i32) {
    %c0_i32 = arith.constant 0 : i32
    %c0_i32_0 = arith.constant 0 : i32
    %c0_i32_1 = arith.constant 0 : i32
    %c0_i32_2 = arith.constant 0 : i32
    return %c0_i32, %c0_i32_0, %c0_i32_1 : i32, i32, i32
  }
  func.func @transform_6(%arg0: i32, %arg1: i32) -> (i32, i32, i32) {
    %c0_i32 = arith.constant 0 : i32
    %c0_i32_0 = arith.constant 0 : i32
    %c0_i32_1 = arith.constant 0 : i32
    %c0_i32_2 = arith.constant 0 : i32
    return %c0_i32, %c0_i32_0, %c0_i32_1 : i32, i32, i32
  }
  func.func @transform_7(%arg0: i32, %arg1: i32) -> (i32, i32, i32) {
    %c0_i32 = arith.constant 0 : i32
    %c0_i32_0 = arith.constant 0 : i32
    %c0_i32_1 = arith.constant 0 : i32
    %c0_i32_2 = arith.constant 0 : i32
    return %c0_i32, %c0_i32_0, %c0_i32_1 : i32, i32, i32
  }
  func.func @transform_8(%arg0: i32, %arg1: i32) -> (i32, i32, i32) {
    %c0_i32 = arith.constant 0 : i32
    %c0_i32_0 = arith.constant 0 : i32
    %c0_i32_1 = arith.constant 0 : i32
    %c0_i32_2 = arith.constant 0 : i32
    return %c0_i32, %c0_i32_0, %c0_i32_1 : i32, i32, i32
  }
  func.func @transform_9(%arg0: i32, %arg1: i32) -> (i32, i32, i32) {
    %c0_i32 = arith.constant 0 : i32
    %c0_i32_0 = arith.constant 0 : i32
    %c0_i32_1 = arith.constant 0 : i32
    %c0_i32_2 = arith.constant 0 : i32
    return %c0_i32, %c0_i32_0, %c0_i32_1 : i32, i32, i32
  }
  func.func @transform_10(%arg0: i32, %arg1: i32) -> (i32, i32, i32) {
    %c0_i32 = arith.constant 0 : i32
    %c0_i32_0 = arith.constant 0 : i32
    %c0_i32_1 = arith.constant 0 : i32
    %c0_i32_2 = arith.constant 0 : i32
    return %c0_i32, %c0_i32_0, %c0_i32_1 : i32, i32, i32
  }
  func.func @transform_11(%arg0: i32, %arg1: i32) -> (i32, i32, i32) {
    %c0_i32 = arith.constant 0 : i32
    %c0_i32_0 = arith.constant 0 : i32
    %c0_i32_1 = arith.constant 0 : i32
    %c0_i32_2 = arith.constant 0 : i32
    return %c0_i32, %c0_i32_0, %c0_i32_1 : i32, i32, i32
  }
  func.func @transform_12(%arg0: i32, %arg1: i32) -> (i32, i32, i32) {
    %c0_i32 = arith.constant 0 : i32
    %c0_i32_0 = arith.constant 0 : i32
    %c0_i32_1 = arith.constant 0 : i32
    %c0_i32_2 = arith.constant 0 : i32
    return %c0_i32, %c0_i32_0, %c0_i32_1 : i32, i32, i32
  }
  func.func @transform_13(%arg0: i32, %arg1: i32) -> (i32, i32, i32) {
    %c0_i32 = arith.constant 0 : i32
    %c0_i32_0 = arith.constant 0 : i32
    %c0_i32_1 = arith.constant 0 : i32
    %c0_i32_2 = arith.constant 0 : i32
    return %c0_i32, %c0_i32_0, %c0_i32_1 : i32, i32, i32
  }
  func.func @transform_14(%arg0: i32, %arg1: i32) -> (i32, i32, i32) {
    %c0_i32 = arith.constant 0 : i32
    %c0_i32_0 = arith.constant 0 : i32
    %c0_i32_1 = arith.constant 0 : i32
    %c0_i32_2 = arith.constant 0 : i32
    return %c0_i32, %c0_i32_0, %c0_i32_1 : i32, i32, i32
  }
  func.func @transform_15(%arg0: i32, %arg1: i32) -> (i32, i32, i32) {
    %c0_i32 = arith.constant 0 : i32
    %c0_i32_0 = arith.constant 0 : i32
    %c0_i32_1 = arith.constant 0 : i32
    %c0_i32_2 = arith.constant 0 : i32
    return %c0_i32, %c0_i32_0, %c0_i32_1 : i32, i32, i32
  }
  func.func @transform_16(%arg0: i32, %arg1: i32) -> (i32, i32) {
    %c0_i32 = arith.constant 0 : i32
    %c0_i32_0 = arith.constant 0 : i32
    %c0_i32_1 = arith.constant 0 : i32
    return %c0_i32, %c0_i32_0 : i32, i32
  }
  func.func @transform_17(%arg0: i32, %arg1: i32) -> (i32, i32) {
    %c0_i32 = arith.constant 0 : i32
    %c0_i32_0 = arith.constant 0 : i32
    %c0_i32_1 = arith.constant 0 : i32
    return %c0_i32, %c0_i32_0 : i32, i32
  }
  func.func @transform_18(%arg0: i32, %arg1: i32) -> (i32, i32, i32, i32) {
    %c0_i32 = arith.constant 0 : i32
    %c0_i32_0 = arith.constant 0 : i32
    %c0_i32_1 = arith.constant 0 : i32
    return %arg0, %arg1, %c0_i32, %c0_i32_0 : i32, i32, i32, i32
  }
}

</mosaic_0001>

<bundles_post_ra>
// kernel: domain_adaptation_forward.3
= control target key start
LH: loop header
LB: loop body
LE: loop exit
PB: predicated region body
PF: predicated region fallthrough
CT: control target
= control target key end

     0   :  { %13 = vsyncpa [#allocation3], 0  ;;  %v526_v3 = vmov 0.0|0.0   ;;  %vm527_vm0 = vmmov 0   ;;  %v528_v11 = vmov 0.0   ;;  %s660_s0 = inlined_call_operand.vmem [shape: f32[2,2,32], index: 0, kind: input, shape index: {}]   ;;  %s661_s1 = inlined_call_operand.vmem [shape: s32[2,1], index: 1, kind: input, shape index: {}]   ;;  %s662_s2 = inlined_call_operand.vmem [shape: f32[32,3], index: 2, kind: input, shape index: {}]   ;;  %s663_s3 = inlined_call_operand.vmem [shape: f32[1,3], index: 3, kind: input, shape index: {}]   ;;  %s664_s4 = inlined_call_operand.vmem [shape: f32[32,2], index: 4, kind: input, shape index: {}]   ;;  %s665_s5 = inlined_call_operand.vmem [shape: f32[1,2], index: 5, kind: input, shape index: {}]   ;;  %s666_s6 = inlined_call_operand.hbm [shape: f32[1,1], index: 6, kind: output, shape index: {0}]   ;;  %s667_s7 = inlined_call_operand.hbm [shape: f32[2,2], index: 7, kind: output, shape index: {1}]  }
   0x1   :  { %v30_v0 = vld [vmem:[%s662_s2] sm:$0xff]  ;;  %v31_v1 = vld [vmem:[%s662_s2 + $0x8] sm:$0xff]  ;;  %440 = vmatprep.subr.bf16.mxu0 %v526_v3  ;;  %446 = vmatprep.subr.bf16.mxu1 %v526_v3  ;;  %v32_v6 = vld [vmem:[%s662_s2 + $0x10] sm:$0xff] }
   0x2   :  { %v115_v2 = vld [vmem:[%s664_s4] sm:$0xff]  ;;  %v441_v4 = vpack.c.bf16 %v31_v1, %v30_v0  ;;  %v116_v5 = vld [vmem:[%s664_s4 + $0x8] sm:$0xff]  ;;  %v33_v7 = vld [vmem:[%s662_s2 + $0x18] sm:$0xff]  ;;  %415 = vmatprep.mubr.msk.f32.mxu0 %vm527_vm0, %v528_v11  ;;  %426 = vmatprep.mubr.msk.f32.mxu1 %vm527_vm0, %v528_v11 }
   0x3   :  { %v447_v8 = vpack.c.bf16 %v116_v5, %v115_v2  ;;  %v117_v9 = vld [vmem:[%s664_s4 + $0x10] sm:$0xff]  ;;  %v118_v10 = vld [vmem:[%s664_s4 + $0x18] sm:$0xff]  ;;  %v444_v12 = vpack.c.bf16 %v33_v7, %v32_v6 }
   0x4   :  { %442 = vmatpush3.bf16.msra.mxu0 %v441_v4 }
   0x5   :  { %14 = vsyncpa [#allocation5], 0  ;;  %448 = vmatpush3.bf16.msra.mxu1 %v447_v8  ;;  %443 = vmatprep.subr.bf16.mxu0 %v526_v3  ;;  %v450_v13 = vpack.c.bf16 %v118_v10, %v117_v9  ;;  %v27_v14 = vld [vmem:[%s660_s0] sm:$0x3]  ;;  %vm41_vm1 = vcmask 261120   ;;  %v529_v16 = vmov 0   ;;  %v270_v41 = vlaneseq }
   0x6   :  { %449 = vmatprep.subr.bf16.mxu1 %v526_v3  ;;  %v386_v15 = vld [vmem:[%s660_s0 + $0x2] sm:$0x3]  ;;  %465 = vset.pattern.permute.xlu0 %v529_v16  ;;  %v389_v17 = vld [vmem:[%s665_s5] ss:$0 sm:$0xff]  ;;  %vm277_vm2 = vcmask 9216   ;;  %vm303_vm3 = vcmask 17408  }
   0x7   :  { %v387_v24 = vld [vmem:[%s663_s3] ss:$0 sm:$0xff]  ;;  %v271_v44 = vand.u32 127, %v270_v41  ;;  %vm339_vm5 = vcmask 9224  }
   0x8   :  { %445 = vmatpush3.bf16.msra.mxu0 %v444_v12  ;;  %v269_v31 = vld [vmem:[%s661_s1] sm:$0x3]  ;;  %s530_s1 = smov [#allocation4]  }
   0x9   :  { %451 = vmatpush3.bf16.msra.mxu1 %v450_v13  ;;  %452 = vmatprep.subr.bf16.mxu0 %v526_v3  ;;  %s374_s3 = sshll.u32 %s530_s1, 4  ;;  %s375_s3 = int_to_ptr.vmem [resolvable:$true] %s374_s3 }
   0xa   :  { %s478_s23 = scalar_lea.vmem %s375_s3, 32  ;;  %p483_p1 = scmp.lt.s32.totalorder %s375_s3, %s375_s3 }
   0xb   :  { %416 = vmatmul.mubr.msk.f32.vlgmr.msra.gmra.mrb[0].mxu0 %vm41_vm1, %v27_v14  ;;  %p479_p0 = scmp.ne.s32.totalorder %s375_s3, %s478_s23  ;;  %p484_p2 = scmp.lt.s32.totalorder %s478_s23, %s478_s23 }
   0xc   :  { %427 = vmatmul.mubr.msk.f32.vlgmr.msra.gmra.mrb[0].mxu1 %vm41_vm1, %v27_v14  ;;  %454 = vmatpush3.bf16.msra.mxu0 %v447_v8 }
   0xd   :  { %455 = vmatprep.subr.bf16.mxu0 %v526_v3  ;;  %437 = vmatprep.mubr.msk.f32.mxu0 %vm527_vm0, %v528_v11  ;;  %p485_p3 = por %p484_p2, %p483_p1 }
   0xf   :  { %p486_p4 = pnand %p485_p3, %p479_p0 }
  0x10   :  { %457 = vmatpush3.bf16.msra.mxu0 %v450_v13 }
  0x13   :  { %438 = vmatmul.mubr.msk.f32.vlgmr.msra.gmra.mrb[2].mxu0 %vm41_vm1, %v386_v15 }
  0xde   :  { %v111_v18 = vpop.f32.mrb[0].mxu0 }
  0xdf   :  { %v192_v19 = vpop.f32.mrb[0].mxu1  ;;  %v417_v20 = vpop.f32.mrb[1].mxu0  ;;  %v614_v28 = vadd.f32 %v387_v24, %v111_v18 }
  0xe0   :  { %v193_v21 = vadd.f32 %v389_v17, %v192_v19  ;;  %v428_v22 = vpop.f32.mrb[1].mxu1 }
  0xe1   :  { %v304_v30 = vsel %vm303_vm3, %v614_v28, -inf }
  0xe2   :  { %v281_v23 = vsel %vm277_vm2, %v193_v21, -inf  ;;  %357 = vst.msk [vmem:[#allocation4] sm:$0x3] %vm277_vm2, %v193_v21 }
  0xe3   :  { %282 = vmax.xlane.f32.xlu1 %v281_v23 }
  0xe6   :  { %v265_v25 = vpop.f32.mrb[2].mxu0 }
  0xe7   :  { %v266_v26 = vadd.f32 %v389_v17, %v265_v25  ;;  %v439_v27 = vpop.f32.mrb[3].mxu0 }
  0xe9   :  { %v326_v29 = vsel %vm277_vm2, %v266_v26, -inf }
  0xea   :  { %327 = vmax.xlane.f32.xlu0 %v326_v29 }
  0xee   :  { %305 = vmax.xlane.f32.xlu0 %v304_v30 }
 0x104   :  { %273 = vperm.xlu0 %465, %v269_v31  }
 0x170   :  { %v622_v32 = vpop.xlane.xlu1 %282 }
 0x171   :  { %v284_v35 = vsub.f32 %v193_v21, %v622_v32 }
 0x173   :  { %v285_v39 = vmul.f32 1.442695, %v284_v35 }
 0x177   :  { %v328_v33 = vpop.xlane.xlu0 %327 }
 0x178   :  { %v329_v34 = vsub.f32 %v266_v26, %v328_v33 }
 0x17a   :  { %v330_v36 = vmul.f32 1.442695, %v329_v34 }
 0x17b   :  { %v625_v37 = vpop.xlane.xlu0 %305 }
 0x17c   :  { %466 = vpow2.f32 %v330_v36  ;;  %v307_v38 = vsub.f32 %v614_v28, %v625_v37 }
 0x17e   :  { %v308_v40 = vmul.f32 1.442695, %v307_v38 }
 0x180   :  { %468 = vpow2.f32 %v308_v40 }
 0x181   :  { %470 = vpow2.f32 %v285_v39 }
 0x183   :  { %v274_v46 = vpop.permute.xlu0 %273 }
 0x184   :  { %vm275_vm4 = vcmp.eq.s32.totalorder %v271_v44, %v274_v46 }
 0x185   :  { %v276_v50 = vsel %vm275_vm4, %v193_v21, 0.0 }
 0x186   :  { %v467_v42 = vpop.eup %466  ;;  %v278_v51 = vsel %vm277_vm2, %v276_v50, 0.0 }
 0x187   :  { %v332_v43 = vsel %vm277_vm2, %v467_v42, 0.0 }
 0x188   :  { %333 = vadd.xlane.f32.xlu1 %v332_v43 }
 0x18a   :  { %v469_v45 = vpop.eup %468 }
 0x18b   :  { %v310_v47 = vsel %vm303_vm3, %v469_v45, 0.0  ;;  %v471_v48 = vpop.eup %470 }
 0x18c   :  { %311 = vadd.xlane.f32.xlu1 %v310_v47  ;;  %v287_v49 = vsel %vm277_vm2, %v471_v48, 0.0 }
 0x190   :  { %288 = vadd.xlane.f32.xlu1 %v287_v49 }
 0x194   :  { %279 = vadd.xlane.f32.xlu1 %v278_v51 }
 0x215   :  { %v334_v52 = vpop.xlane.xlu1 %333 }
 0x216   :  { %472 = vlog2.f32 %v334_v52 }
 0x220   :  { %v473_v53 = vpop.eup %472 }
 0x221   :  { %v336_v54 = vmul.f32 0.6931472, %v473_v53 }
 0x223   :  { %v337_v55 = vadd.f32 %v336_v54, %v328_v33 }
 0x225   :  { %v338_v56 = vsub.f32 %v337_v55, %v266_v26 }
 0x227   :  { %v340_v57 = vsel %vm339_vm5, %v338_v56, 0.0 }
 0x228   :  { %v341_v58 = vrot.slane %v340_v57, 4 }
 0x22a   :  { %v342_v59 = vadd.f32 %v341_v58, %v340_v57 }
 0x22c   :  { %v343_v60 = vrot.slane %v342_v59, 2 }
 0x22e   :  { %v344_v61 = vadd.f32 %v343_v60, %v342_v59 }
 0x230   :  { %v345_v62 = vrot.slane %v344_v61, 1 }
 0x231   :  { %489 = shalt.err (!%p486_p4)
}
 0x232   :  { %s490_s26 = scalar_lea.hbm %s667_s7, 32 }
 0x233   :  { %p491_p5 = scmp.ne.s32.totalorder %s667_s7, %s490_s26  ;;  %p494_p6 = scmp.lt.u32.totalorder %s490_s26, %s667_s7 }
 0x235   :  { %p496_p7 = pnand %p494_p6, %p491_p5 }
 0x237   :  { %499 = shalt.err (!%p496_p7)
}
 0x238   :  { %377 = dma.vmem_to_hbm [thread:$0]  %s375_s3, 32, %s667_s7, [#allocation5]   ;;  %v346_v63 = vadd.f32 %v345_v62, %v344_v61  ;;  %v312_v1 = vpop.xlane.xlu1 %311  ;;  %vm317_vm6 = vcmask 1024   ;;  %vm294_vm7 = vcmask 1041408   ;;  %vm355_vm8 = vcmask 0  }
 0x239   :  { %s531_s10 = smov 127   ;;  %474 = vlog2.f32 %v312_v1  ;;  %s532_s7 = smov [#allocation2]  }
 0x23a   :  { %v347_v0 = vmul.f32 0.5, %v346_v63  ;;  %s364_s11 = sshll.u32 %s532_s7, 4  ;;  %s365_s11 = int_to_ptr.vmem [resolvable:$true] %s364_s11 }
 0x23b   :  { %s500_s12 = scalar_lea.vmem %s365_s11, 16  ;;  %s504_s13 = scalar_lea.vmem %s365_s11, 32 }
 0x23c   :  { %349 = vrot.lane.b32.xlu1 %v347_v0, %s531_s10  ;;  %v289_v2 = vpop.xlane.xlu1 %288  ;;  %p501_p8 = scmp.ne.s32.totalorder %s365_s11, %s500_s12  ;;  %p505_p9 = scmp.lt.s32.totalorder %s365_s11, %s365_s11 }
 0x23d   :  { %476 = vlog2.f32 %v289_v2  ;;  %p506_p10 = scmp.lt.s32.totalorder %s504_s13, %s500_s12 }
 0x23f   :  { %p507_p11 = por %p506_p10, %p505_p9 }
 0x240   :  { %v280_v10 = vpop.xlane.xlu1 %279 }
 0x241   :  { %p508_p12 = pnand %p507_p11, %p501_p8 }
 0x243   :  { %v475_v3 = vpop.eup %474 }
 0x244   :  { %v314_v4 = vmul.f32 0.6931472, %v475_v3 }
 0x246   :  { %v315_v6 = vadd.f32 %v314_v4, %v625_v37 }
 0x247   :  { %v477_v5 = vpop.eup %476 }
 0x248   :  { %v291_v7 = vmul.f32 0.6931472, %v477_v5  ;;  %v316_v8 = vsub.f32 %v315_v6, %v614_v28 }
 0x24a   :  { %v292_v9 = vadd.f32 %v291_v7, %v622_v32  ;;  %v318_v12 = vsel %vm317_vm6, %v316_v8, 0.0 }
 0x24b   :  { %v319_v13 = vrot.slane %v318_v12, 4 }
 0x24c   :  { %v293_v11 = vsub.f32 %v292_v9, %v280_v10 }
 0x24d   :  { %v320_v16 = vadd.f32 %v319_v13, %v318_v12 }
 0x24e   :  { %v295_v14 = vsel %vm294_vm7, %v293_v11, 0.0 }
 0x24f   :  { %v296_v15 = vrot.slane %v295_v14, 4  ;;  %v321_v18 = vrot.slane %v320_v16, 2 }
 0x251   :  { %v297_v17 = vadd.f32 %v296_v15, %v295_v14  ;;  %v322_v20 = vadd.f32 %v321_v18, %v320_v16 }
 0x253   :  { %v298_v19 = vrot.slane %v297_v17, 2  ;;  %v323_v22 = vrot.slane %v322_v20, 1 }
 0x255   :  { %v299_v21 = vadd.f32 %v298_v19, %v297_v17  ;;  %v324_v23 = vadd.f32 %v323_v22, %v322_v20 }
 0x257   :  { %v300_v24 = vrot.slane %v299_v21, 1  ;;  %v325_v25 = vmul.f32 0.5, %v324_v23 }
 0x259   :  { %v301_v26 = vadd.f32 %v300_v24, %v299_v21 }
 0x25b   :  { %v302_v30 = vmul.f32 0.5, %v301_v26 }
 0x2ae   :  { %v350_v27 = vpop.permute.xlu1 %349 }
 0x2af   :  { %v352_v28 = vadd.f32 %v350_v27, %v325_v25 }
 0x2b1   :  { %v353_v29 = vmul.f32 0.1, %v352_v28 }
 0x2b3   :  { %v354_v31 = vadd.f32 %v353_v29, %v302_v30 }
 0x2b5   :  { %356 = vst.msk [vmem:[#allocation2] sm:$0x1] %vm355_vm8, %v354_v31 }
 0x2b6   :  { %511 = shalt.err (!%p508_p12)
}
 0x2b7   :  { %s512_s16 = scalar_lea.hbm %s666_s6, 16 }
 0x2b8   :  { %p513_p13 = scmp.ne.s32.totalorder %s666_s6, %s512_s16  ;;  %p516_p0 = scmp.lt.u32.totalorder %s512_s16, %s666_s6 }
 0x2ba   :  { %p518_p1 = pnand %p516_p0, %p513_p13 }
 0x2bc   :  { %521 = shalt.err (!%p518_p1)
}
 0x2bd   :  { %367 = dma.vmem_to_hbm [thread:$0]  %s365_s11, 16, %s666_s6, [#allocation3]  }
 0x2be   :  { %522 = dma.done.wait [#allocation3], 16  }
 0x2bf   :  { %523 = vsyncadd [#allocation3], 4294967280 }
 0x2c0   :  { %524 = dma.done.wait [#allocation5], 32  }
 0x2c1   :  { %525 = vsyncadd [#allocation5], 4294967264 }
 0x2c2   :  { %384 = vsyncpa [#allocation3], 1 }
 0x2c3   :  { %385 = vsyncpa [#allocation5], 1 }

// kernel: domain_adaptation_forward.2
= control target key start
LH: loop header
LB: loop body
LE: loop exit
PB: predicated region body
PF: predicated region fallthrough
CT: control target
= control target key end

     0   :  { %s4164_s27 = smov 0   ;;  %s4166_s28 = smov 0   ;;  %s4649_s0 = inlined_call_operand.vmem [shape: f32[2,2,8,32], index: 0, kind: input, shape index: {}]   ;;  %s4650_s1 = inlined_call_operand.vmem [shape: f32[2,2,1,8], index: 1, kind: input, shape index: {}]   ;;  %s4651_s2 = inlined_call_operand.vmem [shape: f32[1,32], index: 2, kind: input, shape index: {}]   ;;  %s4652_s3 = inlined_call_operand.vmem [shape: f32[1,32], index: 3, kind: input, shape index: {}]   ;;  %s4653_s4 = inlined_call_operand.vmem [shape: f32[2,32,96], index: 4, kind: input, shape index: {}]   ;;  %s4654_s5 = inlined_call_operand.vmem [shape: f32[2,1,96], index: 5, kind: input, shape index: {}]   ;;  %s4655_s6 = inlined_call_operand.vmem [shape: f32[2,32,32], index: 6, kind: input, shape index: {}]   ;;  %s4656_s7 = inlined_call_operand.vmem [shape: f32[2,1,32], index: 7, kind: input, shape index: {}]   ;;  %s4657_s8 = inlined_call_operand.vmem [shape: f32[2,1,32], index: 8, kind: input, shape index: {}]   ;;  %s4658_s9 = inlined_call_operand.vmem [shape: f32[2,1,32], index: 9, kind: input, shape index: {}]   ;;  %s4659_s10 = inlined_call_operand.vmem [shape: f32[2,32,64], index: 10, kind: input, shape index: {}]   ;;  %s4660_s11 = inlined_call_operand.vmem [shape: f32[2,1,64], index: 11, kind: input, shape index: {}]   ;;  %s4661_s12 = inlined_call_operand.vmem [shape: f32[2,64,32], index: 12, kind: input, shape index: {}]   ;;  %s4662_s13 = inlined_call_operand.vmem [shape: f32[2,1,32], index: 13, kind: input, shape index: {}]   ;;  %s4663_s14 = inlined_call_operand.vmem [shape: f32[2,1,32], index: 14, kind: input, shape index: {}]   ;;  %s4664_s15 = inlined_call_operand.vmem [shape: f32[2,1,32], index: 15, kind: input, shape index: {}]   ;;  %s4665_s16 = inlined_call_operand.vmem [shape: f32[32,32], index: 16, kind: input, shape index: {}]   ;;  %s4666_s17 = inlined_call_operand.vmem [shape: f32[1,32], index: 17, kind: input, shape index: {}]   ;;  %s4667_s18 = inlined_call_operand.vmem [shape: f32[2,2,1,32], index: 18, kind: output, shape index: {}]  }
   0x1   :  { %4678 = sst [smem:[#allocation2_spill]] %s4649_s0  ;;  %s4168_s29 = smov 0  }
   0x2   :  { %4679 = sst [smem:[#allocation3_spill]] %s4650_s1  ;;  %s4170_s30 = smov 0  }
   0x3   :  { %4680 = sst [smem:[#allocation4_spill]] %s4651_s2  ;;  %s4172_s0 = smov 0  }
   0x4 LB: > { %s37_s19 = sadd.s32 1, %s4045_s29  ;;  %s40_s1 = sadd.s32 1, %s4049_s30  ;;  %s4053_s0 = sphi %s4172_s0, %s28_s0   ;;  %s4049_s30 = sphi %s4170_s30, %s4697_s30   ;;  %s4045_s29 = sphi %s4168_s29, %s4696_s29   ;;  %s4041_s28 = sphi %s4166_s28, %s4695_s28   ;;  %s4037_s27 = sphi %s4164_s27, %s4694_s27  }
   0x5   : > { %p38_p0 = scmp.ge.s32.totalorder %s37_s19, 2  ;;  %p3462_p1 = scmp.ge.s32.totalorder %s4053_s0, 1 }
   0x6   : > { %p545_p2 = scmp.lt.s32.totalorder %s4053_s0, 5 }
   0x7   : > { %s4699_s19 = smov (%p38_p0, %s37_s19), 0  ;;  %s4701_s1 = smov (!%p38_p0, %s40_s1), %s4049_s30 }
   0x8   : > { %p546_p3 = pnand %p3462_p1, %p545_p2  ;;  %p42_p4 = scmp.ge.s32.totalorder %s4701_s1, 2 }
   0x9   : > { %p611_p5 = scmp.lt.s32.totalorder (!%p546_p3), %s4041_s28, 1  ;;  %p613_p6 = scmp.lt.s32.totalorder (!%p546_p3), %s4037_s27, 1  ;;  %vm637_vm0 = vcmask (!%p546_p3), 261120   ;;  %v666_v7 = vld [vmem:[%s4653_s4] sm:$0xff] (!%p546_p3)  ;;  %v667_v8 = vld [vmem:[%s4653_s4 + $0x8] sm:$0xff] (!%p546_p3)  ;;  %v668_v9 = vld [vmem:[%s4653_s4 + $0x10] sm:$0xff] (!%p546_p3) }
   0xa   : > { %s4703_s1 = smov (%p42_p4, %s4701_s1), 0  ;;  %549 = sbr.rel (%p546_p3) target bundleno = 7880 (0x1ec8), region = 92 }
   0xb   : > { %s4681_s24 = sld [smem:[#allocation2_spill]] (!%p546_p3)  ;;  %v4055_v10 = vmov (!%p546_p3), 0.0|0.0   ;;  %v3860_v11 = vpack.c.bf16 (!%p546_p3), %v667_v8, %v666_v7  ;;  %v669_v12 = vld [vmem:[%s4653_s4 + $0x18] sm:$0xff] (!%p546_p3)  ;;  %vm4056_vm1 = vmmov (!%p546_p3), 0   ;;  %v4057_v13 = vmov (!%p546_p3), 0.0   ;;  %s4676_s23 = smov (!%p546_p3), 120  }
   0xc   : > { %3859 = vmatprep.subr.bf16.mxu0 (!%p546_p3), %v4055_v10  ;;  %3654 = vmatprep.mubr.msk.f32.mxu0 (!%p546_p3), %vm4056_vm1, %v4057_v13  ;;  %v3863_v14 = vpack.c.bf16 (!%p546_p3), %v669_v12, %v668_v9  ;;  %v3468_v21 = vld [vmem:[%s4652_s3] ss:$0 sm:$0xff] (!%p546_p3)  ;;  %vm757_vm2 = vcmask (!%p546_p3), 64512   ;;  %s4673_s2 = smov (!%p546_p3), 64   ;;  %s4674_s26 = smov (!%p546_p3), 80   ;;  %v751_v52 = vld [vmem:[%s4655_s6 + $0x8] sm:$0xff] (!%p546_p3) }
   0xd   : > { %3657 = vmatprep.subr.mxu1 (!%p546_p3), %v4057_v13  ;;  %3659 = vmatprep.mubr.msk.f32.mxu1 (!%p546_p3), %vm4056_vm1, %v4057_v13  ;;  %v3469_v24 = vld [vmem:[%s4654_s5] ss:$0 sm:$0xff] (!%p546_p3)  ;;  %vm1868_vm3 = vcmask (!%p546_p3), 523264   ;;  %vm3361_vm4 = vcmask (!%p546_p3), 253952  }
   0xe   : > { %3861 = vmatpush3.bf16.msra.mxu0 (!%p546_p3), %v3860_v11  ;;  %v750_v61 = vld [vmem:[%s4655_s6] sm:$0xff] (!%p546_p3) }
   0xf   : > { %3862 = vmatprep.subr.bf16.mxu0 (!%p546_p3), %v4055_v10 }
  0x11   : > { %s4705_s28 = smov (!%p611_p5, %s4041_s28), 1  ;;  %s4707_s27 = smov (!%p613_p6, %s4037_s27), 1 }
  0x12   : > { %s3463_s20 = sshll.u32 %s4705_s28, 1  ;;  %3864 = vmatpush3.bf16.msra.mxu0 %v3863_v14  ;;  %s4683_s28 = sld [smem:[#allocation3_spill]] }
  0x13   : > { %s4194_s21 = sadd.s32 %s3463_s20, %s4707_s27  ;;  %3667 = vmatprep.subr.mxu0 %v4057_v13  ;;  %s4682_s27 = sld [smem:[#allocation4_spill]] }
  0x14   : > { %s3464_s22 = sshll.u32 %s4194_s21, 3 }
  0x15   : > { %s618_s25 = scalar_lea.vmem %s4681_s24, %s3464_s22  ;;  %s4677_s24 = smov 96  }
  0x16   : > { %v633_v0 = vld [vmem:[%s618_s25] sm:$0xff]  ;;  %s4060_s25 = smov 88   ;;  %s4675_s22 = smov 56  }
  0x17   : > { %v638_v1 = vsel %vm637_vm0, %v633_v0, 0.0 }
  0x18   : > { %639 = vadd.xlane.f32.xlu0 %v638_v1  ;;  %s625_s20 = scalar_lea.vmem %s4683_s28, %s4194_s21  ;;  %s4669_s28 = smov 48  }
  0x19   : > { %v3467_v19 = vld [vmem:[%s4682_s27] ss:$0 sm:$0xff]  ;;  %s4668_s27 = smov 112  }
  0x1a   : > { %v4260_v31 = vld [vmem:[%s625_s20] ss:$0 sm:$0xff]  ;;  %s4670_s20 = smov 104  }
  0xa5   : > { %v640_v2 = vpop.xlane.xlu0 %639 }
  0xa6   : > { %v642_v3 = vmul.f32 0.03125, %v640_v2 }
  0xa8   : > { %v643_v4 = vsub.f32 %v633_v0, %v642_v3 }
  0xaa   : > { %v644_v5 = vmul.f32 %v643_v4, %v643_v4 }
  0xac   : > { %v645_v6 = vsel %vm637_vm0, %v644_v5, 0.0 }
  0xad   : > { %646 = vadd.xlane.f32.xlu0 %v645_v6 }
 0x13a   : > { %v647_v15 = vpop.xlane.xlu0 %646 }
 0x13b   : > { %v648_v16 = vmul.f32 0.03125, %v647_v15 }
 0x13d   : > { %v649_v17 = vadd.f32 1e-12, %v648_v16 }
 0x13f   : > { %3967 = vrsqrt.f32 %v649_v17 }
 0x149   : > { %v3968_v18 = vpop.eup %3967 }
 0x14a   : > { %v651_v20 = vmul.f32 %v3968_v18, %v643_v4 }
 0x14c   : > { %v658_v22 = vmul.f32 %v3467_v19, %v651_v20 }
 0x14e   : > { %v4228_v23 = vadd.f32 %v3468_v21, %v658_v22 }
 0x150   : > { %3655 = vmatmul.mubr.msk.f32.vlgmr.msra.gmra.mrb[0].mxu0 %vm637_vm0, %v4228_v23 }
 0x151   : > { %3669 = vmatprep.mubr.msk.f32.mxu0 %vm4056_vm1, %v4057_v13 }
 0x223   : > { %v746_v25 = vpop.f32.mrb[0].mxu0 }
 0x224   : > { %v4237_v26 = vadd.f32 %v3469_v24, %v746_v25  ;;  %v3656_v27 = vpop.f32.mrb[1].mxu0 }
 0x226   : > { %927 = vrot.lane.b32.xlu0 %v4237_v26, %s4676_s23  ;;  %755 = vrot.lane.b32.xlu1 %v4237_v26, %s4677_s24 }
 0x22a   : > { %929 = vrot.lane.b32.xlu1 %v4237_v26, %s4060_s25 }
 0x298   : > { %v756_v28 = vpop.permute.xlu1 %755  ;;  %v928_v30 = vpop.permute.xlu0 %927 }
 0x299   : > { %3658 = vmatpush3.xpose.msk.msra.mxu1 %vm757_vm2, %v756_v28 }
 0x29a   : > { %3662 = vmatprep.subr.mxu1 %v4057_v13 }
 0x29c   : > { %3660 = vmatmul.mubr.msk.f32.vlgmr.msra.gmra.mrb[0].mxu1 %vm757_vm2, %v4237_v26  ;;  %v930_v29 = vpop.permute.xlu1 %929 }
 0x29d   : > { %3668 = vmatpush3.xpose.msk.msra.mxu0 %vm757_vm2, %v930_v29  ;;  %3664 = vmatprep.mubr.msk.f32.mxu1 %vm4056_vm1, %v4057_v13  ;;  %v752_v29 = vld [vmem:[%s4655_s6 + $0x10] sm:$0xff] }
 0x29e   : > { %3677 = vmatprep.subr.mxu0 %v4057_v13 }
 0x2a0   : > { %3670 = vmatmul.mubr.msk.f32.vlgmr.msra.gmra.mrb[2].mxu0 %vm757_vm2, %v928_v30 }
 0x2a1   : > { %3679 = vmatprep.mubr.msk.f32.mxu0 %vm4056_vm1, %v4057_v13  ;;  %3678 = vmatpush3.msra.mxu0 %v751_v52 }
 0x2a2   : > { %3687 = vmatprep.subr.mxu0 %v4057_v13 }
 0x36f   : > { %v828_v32 = vpop.f32.mrb[0].mxu1 }
 0x370   : > { %v832_v33 = vmul.f32 0.35355338, %v828_v32  ;;  %v3661_v34 = vpop.f32.mrb[1].mxu1 }
 0x372   : > { %v839_v35 = vadd.f32 %v4260_v31, %v832_v33 }
 0x373   : > { %v1001_v36 = vpop.f32.mrb[2].mxu0 }
 0x374   : > { %v1005_v37 = vmul.f32 0.35355338, %v1001_v36  ;;  %v3671_v38 = vpop.f32.mrb[3].mxu0  ;;  %v840_v39 = vsel %vm757_vm2, %v839_v35, -inf }
 0x375   : > { %841 = vmax.xlane.f32.xlu1 %v840_v39 }
 0x376   : > { %v1006_v40 = vadd.f32 %v4260_v31, %v1005_v37 }
 0x378   : > { %v1007_v41 = vsel %vm757_vm2, %v1006_v40, -inf }
 0x379   : > { %1008 = vmax.xlane.f32.xlu0 %v1007_v41 }
 0x38f   : > { %1018 = vrot.lane.b32.xlu0 %v4237_v26, %s4675_s22  ;;  %s4689_s22 = smov 112  }
 0x402   : > { %v842_v42 = vpop.xlane.xlu1 %841 }
 0x403   : > { %v843_v43 = vsub.f32 %v839_v35, %v842_v42 }
 0x405   : > { %v844_v44 = vmul.f32 1.442695, %v843_v43  ;;  %v753_v43 = vld [vmem:[%s4655_s6 + $0x18] sm:$0xff] }
 0x406   : > { %v1009_v45 = vpop.xlane.xlu0 %1008 }
 0x407   : > { %3969 = vpow2.f32 %v844_v44  ;;  %v1010_v46 = vsub.f32 %v1006_v40, %v1009_v45 }
 0x409   : > { %v1011_v47 = vmul.f32 1.442695, %v1010_v46 }
 0x40a   : > { %v1019_v58 = vpop.permute.xlu0 %1018 }
 0x40b   : > { %3971 = vpow2.f32 %v1011_v47 }
 0x411   : > { %v3970_v48 = vpop.eup %3969 }
 0x412   : > { %v846_v49 = vsel %vm757_vm2, %v3970_v48, 0.0 }
 0x413   : > { %847 = vadd.xlane.f32.xlu1 %v846_v49 }
 0x415   : > { %v3972_v50 = vpop.eup %3971 }
 0x416   : > { %v1013_v51 = vsel %vm757_vm2, %v3972_v50, 0.0 }
 0x417   : > { %1014 = vadd.xlane.f32.xlu1 %v1013_v51 }
 0x428   : > { %851 = vrot.lane.b32.xlu1 %v4237_v26, %s4673_s2  ;;  %s4687_s2 = smov 80  }
 0x42c   : > { %1242 = vrot.lane.b32.xlu1 %v4237_v26, %s4674_s26  ;;  %s4693_s26 = smov 40  }
 0x430   : > { %1240 = vrot.lane.b32.xlu1 %v4237_v26, %s4668_s27  ;;  %s4671_s27 = smov 72  }
 0x4a0   : > { %v848_v53 = vpop.xlane.xlu1 %847 }
 0x4a1   : > { %3973 = vrcp.f32 %v848_v53  ;;  %v3488_v53 = vld [vmem:[%s4656_s7] ss:$0 sm:$0xff] }
 0x4a4   : > { %v1015_v54 = vpop.xlane.xlu1 %1014 }
 0x4a5   : > { %3975 = vrcp.f32 %v1015_v54 }
 0x4a8   : > { %v852_v55 = vpop.permute.xlu1 %851 }
 0x4a9   : > { %3663 = vmatpush3.msra.mxu1 %v852_v55 }
 0x4aa   : > { %3672 = vmatprep.subr.mxu1 %v4057_v13 }
 0x4ab   : > { %v3974_v56 = vpop.eup %3973 }
 0x4ac   : > { %v850_v57 = vmul.f32 %v3974_v56, %v3970_v48  ;;  %v1243_v0 = vpop.permute.xlu1 %1242 }
 0x4ae   : > { %3665 = vmatmul.mubr.msk.f32.vlgmr.msra.gmra.mrb[2].mxu1 %vm757_vm2, %v850_v57 }
 0x4af   : > { %v3976_v59 = vpop.eup %3975  ;;  %3673 = vmatpush3.msra.mxu1 %v1019_v58  ;;  %3674 = vmatprep.mubr.msk.f32.mxu1 %vm4056_vm1, %v4057_v13 }
 0x4b0   : > { %v1017_v60 = vmul.f32 %v3976_v59, %v3972_v50  ;;  %3682 = vmatprep.subr.mxu1 %v4057_v13  ;;  %v1241_v3 = vpop.permute.xlu1 %1240 }
 0x4b2   : > { %3675 = vmatmul.mubr.msk.f32.vlgmr.msra.gmra.mrb[4].mxu1 %vm757_vm2, %v1017_v60 }
 0x4b3   : > { %3684 = vmatprep.mubr.msk.f32.mxu1 %vm4056_vm1, %v4057_v13  ;;  %3683 = vmatpush3.msra.mxu1 %v750_v61 }
 0x4b4   : > { %3692 = vmatprep.subr.mxu1 %v4057_v13 }
 0x581   : > { %v923_v62 = vpop.f32.mrb[2].mxu1 }
 0x582   : > { %v3666_v63 = vpop.f32.mrb[3].mxu1  ;;  %3685 = vmatmul.mubr.msk.f32.vlgmr.msra.gmra.mrb[6].mxu1 %vm757_vm2, %v923_v62 }
 0x583   : > { %3694 = vmatprep.mubr.msk.f32.mxu1 %vm4056_vm1, %v4057_v13 }
 0x585   : > { %v1090_v1 = vpop.f32.mrb[4].mxu1 }
 0x586   : > { %v3676_v2 = vpop.f32.mrb[5].mxu1  ;;  %3680 = vmatmul.mubr.msk.f32.vlgmr.msra.gmra.mrb[4].mxu0 %vm757_vm2, %v1090_v1  ;;  %v1761_v1 = vld [vmem:[%s4659_s10 + $0x8] sm:$0xff] }
 0x587   : > { %3688 = vmatpush3.xpose.msk.msra.mxu0 %vm757_vm2, %v1243_v0  ;;  %3689 = vmatprep.mubr.msk.f32.mxu0 %vm4056_vm1, %v4057_v13  ;;  %v1760_v0 = vld [vmem:[%s4659_s10] sm:$0xff] }
 0x588   : > { %3697 = vmatprep.subr.mxu0 %v4057_v13  ;;  %v3866_v2 = vpack.c.bf16 %v1761_v1, %v1760_v0  ;;  %v3495_v0 = vld [vmem:[%s4663_s14] ss:$0 sm:$0xff] }
 0x58a   : > { %3690 = vmatmul.mubr.msk.f32.vlgmr.msra.gmra.mrb[6].mxu0 %vm757_vm2, %v1241_v3  ;;  %v1763_v3 = vld [vmem:[%s4659_s10 + $0x18] sm:$0xff] }
 0x58b   : > { %3699 = vmatprep.mubr.msk.f32.mxu0 %vm4056_vm1, %v4057_v13  ;;  %3698 = vmatpush3.msra.mxu0 %v752_v29 }
 0x58c   : > { %3707 = vmatprep.subr.mxu0 %v4057_v13 }
 0x655   : > { %v1236_v4 = vpop.f32.mrb[6].mxu1 }
 0x656   : > { %v3686_v5 = vpop.f32.mrb[7].mxu1 }
 0x659   : > { %v1163_v6 = vpop.f32.mrb[4].mxu0 }
 0x65a   : > { %v1237_v7 = vadd.f32 %v1236_v4, %v1163_v6  ;;  %v3681_v8 = vpop.f32.mrb[5].mxu0 }
 0x65d   : > { %v1314_v9 = vpop.f32.mrb[6].mxu0 }
 0x65e   : > { %v1318_v11 = vmul.f32 0.35355338, %v1314_v9  ;;  %v3691_v12 = vpop.f32.mrb[7].mxu0  ;;  %v3489_v9 = vld [vmem:[%s4657_s8] ss:$0 sm:$0xff] }
 0x65f   : > { %v3490_v12 = vld [vmem:[%s4658_s9] ss:$0 sm:$0xff] }
 0x660   : > { %v1319_v14 = vadd.f32 %v4260_v31, %v1318_v11 }
 0x662   : > { %v1320_v15 = vsel %vm757_vm2, %v1319_v14, -inf }
 0x663   : > { %1321 = vmax.xlane.f32.xlu1 %v1320_v15 }
 0x674   : > { %1331 = vrot.lane.b32.xlu1 %v4237_v26, %s4669_s28  ;;  %s4672_s28 = smov 40  }
 0x678   : > { %1481 = vrot.lane.b32.xlu1 %v4237_v26, %s4670_s20  ;;  %s4685_s20 = smov 120  }
 0x6f0   : > { %v1322_v16 = vpop.xlane.xlu1 %1321 }
 0x6f1   : > { %v1323_v17 = vsub.f32 %v1319_v14, %v1322_v16  ;;  %v1853_v16 = vld [vmem:[%s4661_s12] sm:$0xff] }
 0x6f3   : > { %v1324_v18 = vmul.f32 1.442695, %v1323_v17  ;;  %v1854_v17 = vld [vmem:[%s4661_s12 + $0x8] sm:$0xff] }
 0x6f4   : > { %v1332_v19 = vpop.permute.xlu1 %1331 }
 0x6f5   : > { %3977 = vpow2.f32 %v1324_v18  ;;  %3693 = vmatpush3.msra.mxu1 %v1332_v19  ;;  %v3872_v18 = vpack.c.bf16 %v1854_v17, %v1853_v16  ;;  %v1855_v19 = vld [vmem:[%s4661_s12 + $0x10] sm:$0xff] }
 0x6f6   : > { %3702 = vmatprep.subr.mxu1 %v4057_v13 }
 0x6f8   : > { %v1482_v28 = vpop.permute.xlu1 %1481 }
 0x6ff   : > { %v3978_v20 = vpop.eup %3977 }
 0x700   : > { %v1326_v21 = vsel %vm757_vm2, %v3978_v20, 0.0 }
 0x701   : > { %1327 = vadd.xlane.f32.xlu0 %v1326_v21 }
 0x717   : > { %1483 = vrot.lane.b32.xlu0 %v4237_v26, %s4671_s27  ;;  %s4684_s27 = smov 96  }
 0x78e   : > { %v1328_v22 = vpop.xlane.xlu0 %1327 }
 0x78f   : > { %3979 = vrcp.f32 %v1328_v22  ;;  %v1857_v22 = vld [vmem:[%s4661_s12 + $0x20] sm:$0xff] }
 0x792   : > { %v1484_v27 = vpop.permute.xlu0 %1483 }
 0x799   : > { %v3980_v24 = vpop.eup %3979 }
 0x79a   : > { %v1330_v25 = vmul.f32 %v3980_v24, %v3978_v20  ;;  %v1856_v20 = vld [vmem:[%s4661_s12 + $0x18] sm:$0xff]  ;;  %v1858_v24 = vld [vmem:[%s4661_s12 + $0x28] sm:$0xff] }
 0x79b   : > { %v3875_v21 = vpack.c.bf16 %v1856_v20, %v1855_v19 }
 0x79c   : > { %3695 = vmatmul.mubr.msk.f32.vlgmr.msra.gmra.mrb[8].mxu1 %vm757_vm2, %v1330_v25  ;;  %v3878_v25 = vpack.c.bf16 %v1858_v24, %v1857_v22 }
 0x79d   : > { %3703 = vmatpush3.xpose.msk.msra.mxu1 %vm757_vm2, %v1484_v27  ;;  %3704 = vmatprep.mubr.msk.f32.mxu1 %vm4056_vm1, %v4057_v13  ;;  %v1859_v27 = vld [vmem:[%s4661_s12 + $0x30] sm:$0xff] }
 0x79e   : > { %3712 = vmatprep.subr.mxu1 %v4057_v13 }
 0x7a0   : > { %3705 = vmatmul.mubr.msk.f32.vlgmr.msra.gmra.mrb[10].mxu1 %vm757_vm2, %v1482_v28  ;;  %v1860_v28 = vld [vmem:[%s4661_s12 + $0x38] sm:$0xff] }
 0x7a1   : > { %3714 = vmatprep.mubr.msk.f32.mxu1 %vm4056_vm1, %v4057_v13  ;;  %3713 = vmatpush3.msra.mxu1 %v753_v43  ;;  %v3881_v29 = vpack.c.bf16 %v1860_v28, %v1859_v27 }
 0x7a2   : > { %3871 = vmatprep.subr.bf16.mxu1 %v4055_v10 }
 0x86f   : > { %v1403_v30 = vpop.f32.mrb[8].mxu1 }
 0x870   : > { %v3696_v32 = vpop.f32.mrb[9].mxu1  ;;  %3700 = vmatmul.mubr.msk.f32.vlgmr.msra.gmra.mrb[8].mxu0 %vm757_vm2, %v1403_v30  ;;  %v3491_v30 = vld [vmem:[%s4660_s11] ss:$0 sm:$0xff] }
 0x871   : > { %3709 = vmatprep.mubr.msk.f32.mxu0 %vm4056_vm1, %v4057_v13 }
 0x873   : > { %v1555_v33 = vpop.f32.mrb[10].mxu1 }
 0x874   : > { %v1559_v34 = vmul.f32 0.35355338, %v1555_v33  ;;  %v3706_v35 = vpop.f32.mrb[11].mxu1 }
 0x876   : > { %v1560_v36 = vadd.f32 %v4260_v31, %v1559_v34 }
 0x878   : > { %v1561_v37 = vsel %vm757_vm2, %v1560_v36, -inf }
 0x879   : > { %1562 = vmax.xlane.f32.xlu1 %v1561_v37 }
 0x906   : > { %v1563_v38 = vpop.xlane.xlu1 %1562 }
 0x907   : > { %v1564_v39 = vsub.f32 %v1560_v36, %v1563_v38 }
 0x909   : > { %v1565_v40 = vmul.f32 1.442695, %v1564_v39 }
 0x90b   : > { %3981 = vpow2.f32 %v1565_v40 }
 0x915   : > { %v3982_v41 = vpop.eup %3981 }
 0x916   : > { %v1567_v42 = vsel %vm757_vm2, %v3982_v41, 0.0 }
 0x917   : > { %1568 = vadd.xlane.f32.xlu0 %v1567_v42 }
 0x92d   : > { %1572 = vrot.lane.b32.xlu0 %v4237_v26, %s4672_s28  ;;  %s4688_s28 = smov 64  }
 0x943   : > { %v1476_v44 = vpop.f32.mrb[8].mxu0 }
 0x944   : > { %v1480_v45 = vadd.f32 %v1476_v44, %v1237_v7  ;;  %v3701_v46 = vpop.f32.mrb[9].mxu0  ;;  %v3493_v44 = vld [vmem:[%s4662_s13] ss:$0 sm:$0xff] }
 0x9a4   : > { %v1569_v47 = vpop.xlane.xlu0 %1568 }
 0x9a5   : > { %3983 = vrcp.f32 %v1569_v47 }
 0x9a8   : > { %v1573_v48 = vpop.permute.xlu0 %1572 }
 0x9a9   : > { %3708 = vmatpush3.msra.mxu0 %v1573_v48 }
 0x9aa   : > { %3865 = vmatprep.subr.bf16.mxu0 %v4055_v10 }
 0x9af   : > { %v3984_v49 = vpop.eup %3983 }
 0x9b0   : > { %v1571_v50 = vmul.f32 %v3984_v49, %v3982_v41 }
 0x9b2   : > { %3710 = vmatmul.mubr.msk.f32.vlgmr.msra.gmra.mrb[10].mxu0 %vm757_vm2, %v1571_v50 }
 0x9b3   : > { %3725 = vmatprep.mubr.msk.f32.mxu0 %vm4056_vm1, %v4057_v13  ;;  %3867 = vmatpush3.bf16.msra.mxu0 %v3866_v2  ;;  %v3496_v2 = vld [vmem:[%s4664_s15] ss:$0 sm:$0xff] }
 0x9b4   : > { %3868 = vmatprep.subr.bf16.mxu0 %v4055_v10 }
 0xa85   : > { %v1644_v26 = vpop.f32.mrb[10].mxu0 }
 0xa86   : > { %v3711_v51 = vpop.f32.mrb[11].mxu0  ;;  %3715 = vmatmul.mubr.msk.f32.vlgmr.msra.gmra.mrb[12].mxu1 %vm757_vm2, %v1644_v26 }
 0xa87   : > { %3744 = vmatprep.mubr.msk.f32.mxu1 %vm4056_vm1, %v4057_v13  ;;  %3873 = vmatpush3.bf16.msra.mxu1 %v3872_v18 }
 0xa88   : > { %3874 = vmatprep.subr.bf16.mxu1 %v4055_v10 }
 0xa8b   : > { %3876 = vmatpush3.bf16.msra.mxu1 %v3875_v21 }
 0xa8c   : > { %3877 = vmatprep.subr.bf16.mxu1 %v4055_v10 }
 0xa8f   : > { %3879 = vmatpush3.bf16.msra.mxu1 %v3878_v25 }
 0xa90   : > { %3880 = vmatprep.subr.bf16.mxu1 %v4055_v10 }
 0xa93   : > { %3882 = vmatpush3.bf16.msra.mxu1 %v3881_v29 }
 0xa94   : > { %3763 = vmatprep.subr.mxu1 %v4057_v13 }
 0xb59   : > { %v1717_v52 = vpop.f32.mrb[12].mxu1 }
 0xb5a   : > { %v1721_v54 = vadd.f32 %v1717_v52, %v1480_v45  ;;  %v3716_v55 = vpop.f32.mrb[13].mxu1 }
 0xb5b   : > { %v3498_v55 = vld [vmem:[%s4653_s4 + $0x28] sm:$0xff] }
 0xb5c   : > { %v1729_v56 = vadd.f32 %v3488_v53, %v1721_v54  ;;  %v3497_v54 = vld [vmem:[%s4653_s4 + $0x20] sm:$0xff] }
 0xb5e   : > { %v1730_v57 = vadd.f32 %v1729_v56, %v4228_v23  ;;  %v1762_v23 = vld [vmem:[%s4659_s10 + $0x10] sm:$0xff]  ;;  %v3884_v56 = vpack.c.bf16 %v3498_v55, %v3497_v54 }
 0xb5f   : > { %v3869_v4 = vpack.c.bf16 %v1763_v3, %v1762_v23 }
 0xb60   : > { %v1733_v58 = vsel %vm637_vm0, %v1730_v57, 0.0 }
 0xb61   : > { %1734 = vadd.xlane.f32.xlu1 %v1733_v58  ;;  %3870 = vmatpush3.bf16.msra.mxu0 %v3869_v4  ;;  %v3500_v58 = vld [vmem:[%s4653_s4 + $0x38] sm:$0xff]  ;;  %v3502_v4 = vld [vmem:[%s4654_s5 + $0x1] ss:$0 sm:$0xff] }
 0xb62   : > { %3883 = vmatprep.subr.bf16.mxu0 %v4055_v10 }
 0xbee   : > { %v1735_v59 = vpop.xlane.xlu1 %1734 }
 0xbef   : > { %v1736_v60 = vmul.f32 0.03125, %v1735_v59 }
 0xbf1   : > { %v1737_v61 = vsub.f32 %v1730_v57, %v1736_v60  ;;  %v3499_v57 = vld [vmem:[%s4653_s4 + $0x30] sm:$0xff] }
 0xbf2   : > { %v3887_v59 = vpack.c.bf16 %v3500_v58, %v3499_v57 }
 0xbf3   : > { %v1738_v62 = vmul.f32 %v1737_v61, %v1737_v61 }
 0xbf5   : > { %v1739_v63 = vsel %vm637_vm0, %v1738_v62, 0.0 }
 0xbf6   : > { %1740 = vadd.xlane.f32.xlu1 %v1739_v63 }
 0xc83   : > { %v1741_v5 = vpop.xlane.xlu1 %1740 }
 0xc84   : > { %v1742_v6 = vmul.f32 0.03125, %v1741_v5 }
 0xc86   : > { %v1743_v7 = vadd.f32 1e-12, %v1742_v6 }
 0xc88   : > { %3985 = vrsqrt.f32 %v1743_v7 }
 0xc92   : > { %v3986_v8 = vpop.eup %3985 }
 0xc93   : > { %v1745_v11 = vmul.f32 %v3986_v8, %v1737_v61 }
 0xc95   : > { %v1752_v14 = vmul.f32 %v3489_v9, %v1745_v11 }
 0xc97   : > { %v1759_v15 = vadd.f32 %v3490_v12, %v1752_v14 }
 0xc99   : > { %3726 = vmatmul.mubr.msk.f32.vlgmr.msra.gmra.mrb[12].mxu0 %vm637_vm0, %v1759_v15 }
 0xc9a   : > { %3755 = vmatprep.mubr.msk.f32.mxu0 %vm4056_vm1, %v4057_v13  ;;  %3885 = vmatpush3.bf16.msra.mxu0 %v3884_v56 }
 0xc9b   : > { %3886 = vmatprep.subr.bf16.mxu0 %v4055_v10 }
 0xc9e   : > { %3888 = vmatpush3.bf16.msra.mxu0 %v3887_v59 }
 0xc9f   : > { %3758 = vmatprep.subr.mxu0 %v4057_v13 }
 0xd6c   : > { %v1840_v32 = vpop.f32.mrb[12].mxu0 }
 0xd6d   : > { %v1841_v33 = vadd.f32 %v3491_v30, %v1840_v32  ;;  %v3727_v34 = vpop.f32.mrb[13].mxu0 }
 0xd6f   : > { %v1844_v35 = vmul.f32 %v1841_v33, %v1841_v33 }
 0xd71   : > { %v1845_v36 = vmul.f32 %v1844_v35, %v1841_v33 }
 0xd73   : > { %v1846_v37 = vmul.f32 0.044715, %v1845_v36  ;;  %v3505_v36 = vld [vmem:[%s4655_s6 + $0x28] sm:$0xff] }
 0xd75   : > { %v1847_v38 = vadd.f32 %v1846_v37, %v1841_v33 }
 0xd77   : > { %v1848_v39 = vmul.f32 0.7978846, %v1847_v38 }
 0xd79   : > { %3987 = vtanh.f32 %v1848_v39 }
 0xd83   : > { %v3988_v40 = vpop.eup %3987 }
 0xd84   : > { %v1850_v41 = vadd.f32 1.0, %v3988_v40 }
 0xd86   : > { %v1851_v42 = vmul.f32 0.5, %v1850_v41 }
 0xd88   : > { %v1852_v43 = vmul.f32 %v1851_v42, %v1841_v33 }
 0xd8a   : > { %3745 = vmatmul.mubr.msk.f32.vlgmr.msra.gmra.mrb[14].mxu1 %vm1868_vm3, %v1852_v43 }
 0xd8b   : > { %3765 = vmatprep.mubr.msk.f32.mxu1 %vm4056_vm1, %v4057_v13 }
 0xe5d   : > { %v1938_v45 = vpop.f32.mrb[14].mxu1 }
 0xe5e   : > { %v1939_v46 = vadd.f32 %v3493_v44, %v1938_v45  ;;  %v3746_v47 = vpop.f32.mrb[15].mxu1  ;;  %v3504_v45 = vld [vmem:[%s4655_s6 + $0x20] sm:$0xff] }
 0xe60   : > { %v1942_v48 = vadd.f32 %v1939_v46, %v1759_v15 }
 0xe62   : > { %v1945_v49 = vsel %vm637_vm0, %v1942_v48, 0.0 }
 0xe63   : > { %1946 = vadd.xlane.f32.xlu1 %v1945_v49 }
 0xef0   : > { %v1947_v50 = vpop.xlane.xlu1 %1946 }
 0xef1   : > { %v1948_v26 = vmul.f32 0.03125, %v1947_v50 }
 0xef3   : > { %v1949_v51 = vsub.f32 %v1942_v48, %v1948_v26 }
 0xef5   : > { %v1950_v52 = vmul.f32 %v1949_v51, %v1949_v51 }
 0xef7   : > { %v1951_v53 = vsel %vm637_vm0, %v1950_v52, 0.0 }
 0xef8   : > { %1952 = vadd.xlane.f32.xlu1 %v1951_v53 }
 0xf85   : > { %v1953_v60 = vpop.xlane.xlu1 %1952 }
 0xf86   : > { %v1954_v61 = vmul.f32 0.03125, %v1953_v60 }
 0xf88   : > { %v1955_v62 = vadd.f32 1e-12, %v1954_v61 }
 0xf8a   : > { %3989 = vrsqrt.f32 %v1955_v62 }
 0xf94   : > { %v3990_v63 = vpop.eup %3989 }
 0xf95   : > { %v1957_v1 = vmul.f32 %v3990_v63, %v1949_v51 }
 0xf97   : > { %v1964_v23 = vmul.f32 %v3495_v0, %v1957_v1 }
 0xf99   : > { %v4432_v3 = vadd.f32 %v3496_v2, %v1964_v23 }
 0xf9b   : > { %3756 = vmatmul.mubr.msk.f32.vlgmr.msra.gmra.mrb[14].mxu0 %vm637_vm0, %v4432_v3 }
 0xf9c   : > { %3760 = vmatprep.mubr.msk.f32.mxu0 %vm4056_vm1, %v4057_v13 }
0x106e   : > { %v2054_v5 = vpop.f32.mrb[14].mxu0 }
0x106f   : > { %v4441_v6 = vadd.f32 %v3502_v4, %v2054_v5  ;;  %v3757_v7 = vpop.f32.mrb[15].mxu0 }
0x1071   : > { %2231 = vrot.lane.b32.xlu0 %v4441_v6, %s4060_s25  ;;  %2064 = vrot.lane.b32.xlu1 %v4441_v6, %s4684_s27  ;;  %s4686_s25 = smov 56  }
0x1075   : > { %2229 = vrot.lane.b32.xlu0 %v4441_v6, %s4685_s20  ;;  %s4690_s20 = smov 72  }
0x10e3   : > { %v2065_v8 = vpop.permute.xlu1 %2064  ;;  %v2232_v9 = vpop.permute.xlu0 %2231 }
0x10e4   : > { %3759 = vmatpush3.xpose.msk.msra.mxu0 %vm757_vm2, %v2065_v8 }
0x10e5   : > { %3768 = vmatprep.subr.mxu0 %v4057_v13 }
0x10e7   : > { %3761 = vmatmul.mubr.msk.f32.vlgmr.msra.gmra.mrb[16].mxu0 %vm757_vm2, %v4441_v6  ;;  %v2230_v11 = vpop.permute.xlu0 %2229 }
0x10e8   : > { %3769 = vmatpush3.xpose.msk.msra.mxu0 %vm757_vm2, %v2232_v9  ;;  %3770 = vmatprep.mubr.msk.f32.mxu0 %vm4056_vm1, %v4057_v13  ;;  %v3506_v9 = vld [vmem:[%s4655_s6 + $0x30] sm:$0xff] }
0x10e9   : > { %3778 = vmatprep.subr.mxu0 %v4057_v13 }
0x10eb   : > { %3771 = vmatmul.mubr.msk.f32.vlgmr.msra.gmra.mrb[18].mxu0 %vm757_vm2, %v2230_v11 }
0x10ec   : > { %3780 = vmatprep.mubr.msk.f32.mxu0 %vm4056_vm1, %v4057_v13  ;;  %3779 = vmatpush3.msra.mxu0 %v3505_v36  ;;  %v3525_v36 = vld [vmem:[%s4656_s7 + $0x1] ss:$0 sm:$0xff] }
0x10ed   : > { %3788 = vmatprep.subr.mxu0 %v4057_v13 }
0x11ba   : > { %v2136_v12 = vpop.f32.mrb[16].mxu0 }
0x11bb   : > { %v2140_v14 = vmul.f32 0.35355338, %v2136_v12  ;;  %v3762_v15 = vpop.f32.mrb[17].mxu0 }
0x11bd   : > { %v2141_v16 = vadd.f32 %v4260_v31, %v2140_v14 }
0x11be   : > { %v2303_v17 = vpop.f32.mrb[18].mxu0 }
0x11bf   : > { %v2307_v18 = vmul.f32 0.35355338, %v2303_v17  ;;  %v3772_v19 = vpop.f32.mrb[19].mxu0  ;;  %v2142_v20 = vsel %vm757_vm2, %v2141_v16, -inf }
0x11c0   : > { %2143 = vmax.xlane.f32.xlu0 %v2142_v20 }
0x11c1   : > { %v2308_v21 = vadd.f32 %v4260_v31, %v2307_v18 }
0x11c3   : > { %v2309_v22 = vsel %vm757_vm2, %v2308_v21, -inf }
0x11c4   : > { %2310 = vmax.xlane.f32.xlu1 %v2309_v22 }
0x11d5   : > { %2320 = vrot.lane.b32.xlu1 %v4441_v6, %s4686_s25  ;;  %s4691_s25 = smov 104  }
0x11d9   : > { %2544 = vrot.lane.b32.xlu1 %v4441_v6, %s4687_s2  ;;  %s4692_s2 = smov 48  }
0x124d   : > { %v2144_v24 = vpop.xlane.xlu0 %2143 }
0x124e   : > { %v2145_v25 = vsub.f32 %v2141_v16, %v2144_v24 }
0x1250   : > { %v2146_v27 = vmul.f32 1.442695, %v2145_v25 }
0x1251   : > { %v2311_v28 = vpop.xlane.xlu1 %2310 }
0x1252   : > { %3991 = vpow2.f32 %v2146_v27  ;;  %v2312_v29 = vsub.f32 %v2308_v21, %v2311_v28 }
0x1254   : > { %v2313_v30 = vmul.f32 1.442695, %v2312_v29 }
0x1255   : > { %v2321_v42 = vpop.permute.xlu1 %2320 }
0x1256   : > { %3993 = vpow2.f32 %v2313_v30 }
0x1259   : > { %v2545_v49 = vpop.permute.xlu1 %2544 }
0x125c   : > { %v3992_v32 = vpop.eup %3991 }
0x125d   : > { %v2148_v33 = vsel %vm757_vm2, %v3992_v32, 0.0 }
0x125e   : > { %2149 = vadd.xlane.f32.xlu0 %v2148_v33 }
0x1260   : > { %v3994_v34 = vpop.eup %3993 }
0x1261   : > { %v2315_v35 = vsel %vm757_vm2, %v3994_v34, 0.0 }
0x1262   : > { %2316 = vadd.xlane.f32.xlu0 %v2315_v35 }
0x1278   : > { %2153 = vrot.lane.b32.xlu0 %v4441_v6, %s4688_s28 }
0x127c   : > { %2542 = vrot.lane.b32.xlu0 %v4441_v6, %s4689_s22  ;;  %s632_s22 = scalar_lea.vmem %s4667_s18, %s4194_s21 }
0x12eb   : > { %v2150_v37 = vpop.xlane.xlu0 %2149 }
0x12ec   : > { %3995 = vrcp.f32 %v2150_v37 }
0x12ef   : > { %v2317_v38 = vpop.xlane.xlu0 %2316 }
0x12f0   : > { %3997 = vrcp.f32 %v2317_v38 }
0x12f3   : > { %v2154_v39 = vpop.permute.xlu0 %2153 }
0x12f4   : > { %3764 = vmatpush3.msra.mxu1 %v2154_v39 }
0x12f5   : > { %3773 = vmatprep.subr.mxu1 %v4057_v13 }
0x12f6   : > { %v3996_v40 = vpop.eup %3995 }
0x12f7   : > { %v2152_v41 = vmul.f32 %v3996_v40, %v3992_v32  ;;  %v2543_v26 = vpop.permute.xlu0 %2542 }
0x12f9   : > { %3766 = vmatmul.mubr.msk.f32.vlgmr.msra.gmra.mrb[16].mxu1 %vm757_vm2, %v2152_v41 }
0x12fa   : > { %v3998_v43 = vpop.eup %3997  ;;  %3774 = vmatpush3.msra.mxu1 %v2321_v42  ;;  %3775 = vmatprep.mubr.msk.f32.mxu1 %vm4056_vm1, %v4057_v13 }
0x12fb   : > { %v2319_v44 = vmul.f32 %v3998_v43, %v3994_v34  ;;  %3783 = vmatprep.subr.mxu1 %v4057_v13 }
0x12fd   : > { %3776 = vmatmul.mubr.msk.f32.vlgmr.msra.gmra.mrb[18].mxu1 %vm757_vm2, %v2319_v44 }
0x12fe   : > { %3785 = vmatprep.mubr.msk.f32.mxu1 %vm4056_vm1, %v4057_v13  ;;  %3784 = vmatpush3.msra.mxu1 %v3504_v45 }
0x12ff   : > { %3793 = vmatprep.subr.mxu1 %v4057_v13 }
0x13cc   : > { %v2225_v46 = vpop.f32.mrb[16].mxu1 }
0x13cd   : > { %v3767_v47 = vpop.f32.mrb[17].mxu1  ;;  %3786 = vmatmul.mubr.msk.f32.vlgmr.msra.gmra.mrb[20].mxu1 %vm757_vm2, %v2225_v46 }
0x13ce   : > { %3795 = vmatprep.mubr.msk.f32.mxu1 %vm4056_vm1, %v4057_v13  ;;  %v3530_v47 = vld [vmem:[%s4659_s10 + $0x20] sm:$0xff] }
0x13d0   : > { %v2392_v48 = vpop.f32.mrb[18].mxu1 }
0x13d1   : > { %v3777_v50 = vpop.f32.mrb[19].mxu1  ;;  %3781 = vmatmul.mubr.msk.f32.vlgmr.msra.gmra.mrb[20].mxu0 %vm757_vm2, %v2392_v48  ;;  %v3531_v48 = vld [vmem:[%s4659_s10 + $0x28] sm:$0xff] }
0x13d2   : > { %3789 = vmatpush3.xpose.msk.msra.mxu0 %vm757_vm2, %v2545_v49  ;;  %3790 = vmatprep.mubr.msk.f32.mxu0 %vm4056_vm1, %v4057_v13  ;;  %v3890_v49 = vpack.c.bf16 %v3531_v48, %v3530_v47  ;;  %v3533_v50 = vld [vmem:[%s4659_s10 + $0x38] sm:$0xff] }
0x13d3   : > { %3798 = vmatprep.subr.mxu0 %v4057_v13 }
0x13d5   : > { %3791 = vmatmul.mubr.msk.f32.vlgmr.msra.gmra.mrb[22].mxu0 %vm757_vm2, %v2543_v26 }
0x13d6   : > { %3800 = vmatprep.mubr.msk.f32.mxu0 %vm4056_vm1, %v4057_v13  ;;  %3799 = vmatpush3.msra.mxu0 %v3506_v9 }
0x13d7   : > { %3808 = vmatprep.subr.mxu0 %v4057_v13 }
0x14a0   : > { %v2538_v51 = vpop.f32.mrb[20].mxu1 }
0x14a1   : > { %v3787_v52 = vpop.f32.mrb[21].mxu1 }
0x14a4   : > { %v2465_v53 = vpop.f32.mrb[20].mxu0 }
0x14a5   : > { %v2539_v54 = vadd.f32 %v2538_v51, %v2465_v53  ;;  %v3782_v55 = vpop.f32.mrb[21].mxu0 }
0x14a6   : > { %v3528_v55 = vld [vmem:[%s4657_s8 + $0x1] ss:$0 sm:$0xff] }
0x14a8   : > { %v2616_v56 = vpop.f32.mrb[22].mxu0 }
0x14a9   : > { %v2620_v57 = vmul.f32 0.35355338, %v2616_v56  ;;  %v3792_v58 = vpop.f32.mrb[23].mxu0 }
0x14ab   : > { %v2621_v59 = vadd.f32 %v4260_v31, %v2620_v57  ;;  %v3529_v57 = vld [vmem:[%s4658_s9 + $0x1] ss:$0 sm:$0xff] }
0x14ad   : > { %v2622_v60 = vsel %vm757_vm2, %v2621_v59, -inf }
0x14ae   : > { %2623 = vmax.xlane.f32.xlu1 %v2622_v60  ;;  %v3537_v60 = vld [vmem:[%s4661_s12 + $0x40] sm:$0xff] }
0x14bf   : > { %2785 = vrot.lane.b32.xlu1 %v4441_v6, %s4690_s20 }
0x14c3   : > { %2783 = vrot.lane.b32.xlu1 %v4441_v6, %s4691_s25 }
0x153b   : > { %v2624_v61 = vpop.xlane.xlu1 %2623 }
0x153c   : > { %v2625_v62 = vsub.f32 %v2621_v59, %v2624_v61  ;;  %v3538_v61 = vld [vmem:[%s4661_s12 + $0x48] sm:$0xff] }
0x153e   : > { %v2626_v63 = vmul.f32 1.442695, %v2625_v62  ;;  %v3896_v62 = vpack.c.bf16 %v3538_v61, %v3537_v60 }
0x153f   : > { %v2786_v5 = vpop.permute.xlu1 %2785 }
0x1540   : > { %3999 = vpow2.f32 %v2626_v63  ;;  %v3539_v63 = vld [vmem:[%s4661_s12 + $0x50] sm:$0xff] }
0x1543   : > { %v2784_v8 = vpop.permute.xlu1 %2783 }
0x154a   : > { %v4000_v0 = vpop.eup %3999 }
0x154b   : > { %v2628_v1 = vsel %vm757_vm2, %v4000_v0, 0.0 }
0x154c   : > { %2629 = vadd.xlane.f32.xlu0 %v2628_v1  ;;  %v3541_v1 = vld [vmem:[%s4661_s12 + $0x60] sm:$0xff] }
0x1562   : > { %2633 = vrot.lane.b32.xlu0 %v4441_v6, %s4692_s2 }
0x15d9   : > { %v2630_v2 = vpop.xlane.xlu0 %2629 }
0x15da   : > { %4001 = vrcp.f32 %v2630_v2  ;;  %v3542_v2 = vld [vmem:[%s4661_s12 + $0x68] sm:$0xff] }
0x15dd   : > { %v2634_v23 = vpop.permute.xlu0 %2633 }
0x15de   : > { %3794 = vmatpush3.msra.mxu1 %v2634_v23  ;;  %v3902_v23 = vpack.c.bf16 %v3542_v2, %v3541_v1 }
0x15df   : > { %3803 = vmatprep.subr.mxu1 %v4057_v13 }
0x15e4   : > { %v4002_v4 = vpop.eup %4001 }
0x15e5   : > { %v2632_v7 = vmul.f32 %v4002_v4, %v4000_v0  ;;  %v3543_v4 = vld [vmem:[%s4661_s12 + $0x70] sm:$0xff] }
0x15e7   : > { %3796 = vmatmul.mubr.msk.f32.vlgmr.msra.gmra.mrb[22].mxu1 %vm757_vm2, %v2632_v7 }
0x15e8   : > { %3804 = vmatpush3.xpose.msk.msra.mxu1 %vm757_vm2, %v2786_v5  ;;  %3805 = vmatprep.mubr.msk.f32.mxu1 %vm4056_vm1, %v4057_v13  ;;  %v3544_v5 = vld [vmem:[%s4661_s12 + $0x78] sm:$0xff] }
0x15e9   : > { %3813 = vmatprep.subr.mxu1 %v4057_v13  ;;  %v3905_v7 = vpack.c.bf16 %v3544_v5, %v3543_v4 }
0x15eb   : > { %3806 = vmatmul.mubr.msk.f32.vlgmr.msra.gmra.mrb[24].mxu1 %vm757_vm2, %v2784_v8  ;;  %v3535_v8 = vld [vmem:[%s4660_s11 + $0x1] ss:$0 sm:$0xff] }
0x15ec   : > { %3815 = vmatprep.mubr.msk.f32.mxu1 %vm4056_vm1, %v4057_v13 }
0x16ba   : > { %v2705_v11 = vpop.f32.mrb[22].mxu1 }
0x16bb   : > { %v3797_v12 = vpop.f32.mrb[23].mxu1  ;;  %3801 = vmatmul.mubr.msk.f32.vlgmr.msra.gmra.mrb[24].mxu0 %vm757_vm2, %v2705_v11 }
0x16bc   : > { %3810 = vmatprep.mubr.msk.f32.mxu0 %vm4056_vm1, %v4057_v13 }
0x16be   : > { %v2857_v14 = vpop.f32.mrb[24].mxu1 }
0x16bf   : > { %v2861_v15 = vmul.f32 0.35355338, %v2857_v14  ;;  %v3807_v16 = vpop.f32.mrb[25].mxu1 }
0x16c1   : > { %v2862_v17 = vadd.f32 %v4260_v31, %v2861_v15  ;;  %v3507_v31 = vld [vmem:[%s4655_s6 + $0x38] sm:$0xff] }
0x16c2   : > { %3814 = vmatpush3.msra.mxu1 %v3507_v31 }
0x16c3   : > { %v2863_v18 = vsel %vm757_vm2, %v2862_v17, -inf  ;;  %3895 = vmatprep.subr.bf16.mxu1 %v4055_v10 }
0x16c4   : > { %2864 = vmax.xlane.f32.xlu0 %v2863_v18 }
0x16da   : > { %2874 = vrot.lane.b32.xlu0 %v4441_v6, %s4693_s26 }
0x1751   : > { %v2865_v19 = vpop.xlane.xlu0 %2864 }
0x1752   : > { %v2866_v20 = vsub.f32 %v2862_v17, %v2865_v19 }
0x1754   : > { %v2867_v21 = vmul.f32 1.442695, %v2866_v20 }
0x1755   : > { %v2875_v22 = vpop.permute.xlu0 %2874 }
0x1756   : > { %4003 = vpow2.f32 %v2867_v21  ;;  %3809 = vmatpush3.msra.mxu0 %v2875_v22 }
0x1757   : > { %3889 = vmatprep.subr.bf16.mxu0 %v4055_v10 }
0x1760   : > { %v4004_v24 = vpop.eup %4003 }
0x1761   : > { %v2869_v25 = vsel %vm757_vm2, %v4004_v24, 0.0 }
0x1762   : > { %2870 = vadd.xlane.f32.xlu1 %v2869_v25 }
0x178e   : > { %v2778_v6 = vpop.f32.mrb[24].mxu0 }
0x178f   : > { %v2782_v27 = vadd.f32 %v2778_v6, %v2539_v54  ;;  %v3802_v28 = vpop.f32.mrb[25].mxu0 }
0x17ef   : > { %v2871_v29 = vpop.xlane.xlu1 %2870 }
0x17f0   : > { %4005 = vrcp.f32 %v2871_v29 }
0x17fa   : > { %v4006_v30 = vpop.eup %4005 }
0x17fb   : > { %v2873_v32 = vmul.f32 %v4006_v30, %v4004_v24  ;;  %v3546_v24 = vld [vmem:[%s4662_s13 + $0x1] ss:$0 sm:$0xff] }
0x17fd   : > { %3811 = vmatmul.mubr.msk.f32.vlgmr.msra.gmra.mrb[26].mxu0 %vm757_vm2, %v2873_v32 }
0x17fe   : > { %3826 = vmatprep.mubr.msk.f32.mxu0 %vm4056_vm1, %v4057_v13  ;;  %3891 = vmatpush3.bf16.msra.mxu0 %v3890_v49  ;;  %v3286_v49 = vld [vmem:[%s4666_s17] sm:$0x1] }
0x17ff   : > { %3892 = vmatprep.subr.bf16.mxu0 %v4055_v10 }
0x18d0   : > { %v2946_v33 = vpop.f32.mrb[26].mxu0 }
0x18d1   : > { %v3812_v34 = vpop.f32.mrb[27].mxu0  ;;  %3816 = vmatmul.mubr.msk.f32.vlgmr.msra.gmra.mrb[26].mxu1 %vm757_vm2, %v2946_v33 }
0x18d2   : > { %3845 = vmatprep.mubr.msk.f32.mxu1 %vm4056_vm1, %v4057_v13  ;;  %3897 = vmatpush3.bf16.msra.mxu1 %v3896_v62 }
0x18d3   : > { %3898 = vmatprep.subr.bf16.mxu1 %v4055_v10 }
0x19a4   : > { %v3019_v35 = vpop.f32.mrb[26].mxu1 }
0x19a5   : > { %v3023_v37 = vadd.f32 %v3019_v35, %v2782_v27  ;;  %v3817_v38 = vpop.f32.mrb[27].mxu1  ;;  %v3282_v35 = vld [vmem:[%s4665_s16] sm:$0xff] }
0x19a6   : > { %v3284_v38 = vld [vmem:[%s4665_s16 + $0x10] sm:$0xff] }
0x19a7   : > { %v3032_v39 = vadd.f32 %v3525_v36, %v3023_v37  ;;  %v3283_v36 = vld [vmem:[%s4665_s16 + $0x8] sm:$0xff] }
0x19a8   : > { %v3908_v37 = vpack.c.bf16 %v3283_v36, %v3282_v35 }
0x19a9   : > { %v3033_v40 = vadd.f32 %v3032_v39, %v4432_v3  ;;  %v3532_v3 = vld [vmem:[%s4659_s10 + $0x30] sm:$0xff]  ;;  %v3285_v39 = vld [vmem:[%s4665_s16 + $0x18] sm:$0xff] }
0x19aa   : > { %v3893_v26 = vpack.c.bf16 %v3533_v50, %v3532_v3 }
0x19ab   : > { %v3038_v41 = vsel %vm637_vm0, %v3033_v40, 0.0 }
0x19ac   : > { %3039 = vadd.xlane.f32.xlu1 %v3038_v41  ;;  %3894 = vmatpush3.bf16.msra.mxu0 %v3893_v26 }
0x19ad   : > { %3907 = vmatprep.subr.bf16.mxu0 %v4055_v10 }
0x1a39   : > { %v3040_v42 = vpop.xlane.xlu1 %3039 }
0x1a3a   : > { %v3041_v43 = vmul.f32 0.03125, %v3040_v42 }
0x1a3c   : > { %v3042_v44 = vsub.f32 %v3033_v40, %v3041_v43  ;;  %v3911_v40 = vpack.c.bf16 %v3285_v39, %v3284_v38 }
0x1a3e   : > { %v3043_v45 = vmul.f32 %v3042_v44, %v3042_v44 }
0x1a40   : > { %v3044_v46 = vsel %vm637_vm0, %v3043_v45, 0.0 }
0x1a41   : > { %3045 = vadd.xlane.f32.xlu1 %v3044_v46  ;;  %v3551_v46 = vld [vmem:[%s4664_s15 + $0x1] ss:$0 sm:$0xff] }
0x1ace   : > { %v3046_v51 = vpop.xlane.xlu1 %3045 }
0x1acf   : > { %v3047_v52 = vmul.f32 0.03125, %v3046_v51 }
0x1ad1   : > { %v3048_v53 = vadd.f32 1e-12, %v3047_v52 }
0x1ad3   : > { %4007 = vrsqrt.f32 %v3048_v53 }
0x1add   : > { %v4008_v54 = vpop.eup %4007 }
0x1ade   : > { %v3050_v56 = vmul.f32 %v4008_v54, %v3042_v44 }
0x1ae0   : > { %v3057_v58 = vmul.f32 %v3528_v55, %v3050_v56 }
0x1ae2   : > { %v3064_v59 = vadd.f32 %v3529_v57, %v3057_v58 }
0x1ae4   : > { %3827 = vmatmul.mubr.msk.f32.vlgmr.msra.gmra.mrb[28].mxu0 %vm637_vm0, %v3064_v59 }
0x1ae5   : > { %3856 = vmatprep.mubr.msk.f32.mxu0 %vm4056_vm1, %v4057_v13  ;;  %v3540_v13 = vld [vmem:[%s4661_s12 + $0x58] sm:$0xff]  ;;  %3909 = vmatpush3.bf16.msra.mxu0 %v3908_v37 }
0x1ae6   : > { %v3899_v0 = vpack.c.bf16 %v3540_v13, %v3539_v63  ;;  %3910 = vmatprep.subr.bf16.mxu0 %v4055_v10 }
0x1ae8   : > { %3900 = vmatpush3.bf16.msra.mxu1 %v3899_v0 }
0x1ae9   : > { %3901 = vmatprep.subr.bf16.mxu1 %v4055_v10  ;;  %3912 = vmatpush3.bf16.msra.mxu0 %v3911_v40 }
0x1aec   : > { %3903 = vmatpush3.bf16.msra.mxu1 %v3902_v23 }
0x1aed   : > { %3904 = vmatprep.subr.bf16.mxu1 %v4055_v10  ;;  %v3550_v10 = vld [vmem:[%s4663_s14 + $0x1] ss:$0 sm:$0xff] }
0x1af0   : > { %3906 = vmatpush3.bf16.msra.mxu1 %v3905_v7 }
0x1bb7   : > { %v3147_v9 = vpop.f32.mrb[28].mxu0 }
0x1bb8   : > { %v3148_v11 = vadd.f32 %v3535_v8, %v3147_v9  ;;  %v3828_v12 = vpop.f32.mrb[29].mxu0 }
0x1bba   : > { %v3151_v14 = vmul.f32 %v3148_v11, %v3148_v11 }
0x1bbc   : > { %v3152_v15 = vmul.f32 %v3151_v14, %v3148_v11 }
0x1bbe   : > { %v3153_v16 = vmul.f32 0.044715, %v3152_v15 }
0x1bc0   : > { %v3154_v17 = vadd.f32 %v3153_v16, %v3148_v11 }
0x1bc2   : > { %v3155_v18 = vmul.f32 0.7978846, %v3154_v17 }
0x1bc4   : > { %4009 = vtanh.f32 %v3155_v18 }
0x1bce   : > { %v4010_v19 = vpop.eup %4009 }
0x1bcf   : > { %v3157_v20 = vadd.f32 1.0, %v4010_v19 }
0x1bd1   : > { %v3158_v21 = vmul.f32 0.5, %v3157_v20 }
0x1bd3   : > { %v3159_v22 = vmul.f32 %v3158_v21, %v3148_v11 }
0x1bd5   : > { %3846 = vmatmul.mubr.msk.f32.vlgmr.msra.gmra.mrb[28].mxu1 %vm1868_vm3, %v3159_v22 }
0x1ca8   : > { %v3246_v25 = vpop.f32.mrb[28].mxu1 }
0x1ca9   : > { %v3247_v31 = vadd.f32 %v3546_v24, %v3246_v25  ;;  %v3847_v6 = vpop.f32.mrb[29].mxu1 }
0x1cab   : > { %v3250_v27 = vadd.f32 %v3247_v31, %v3064_v59 }
0x1cad   : > { %v3255_v28 = vsel %vm637_vm0, %v3250_v27, 0.0 }
0x1cae   : > { %3256 = vadd.xlane.f32.xlu1 %v3255_v28 }
0x1d3b   : > { %v3257_v29 = vpop.xlane.xlu1 %3256 }
0x1d3c   : > { %v3258_v30 = vmul.f32 0.03125, %v3257_v29 }
0x1d3e   : > { %v3259_v32 = vsub.f32 %v3250_v27, %v3258_v30 }
0x1d40   : > { %v3260_v33 = vmul.f32 %v3259_v32, %v3259_v32 }
0x1d42   : > { %v3261_v34 = vsel %vm637_vm0, %v3260_v33, 0.0 }
0x1d43   : > { %3262 = vadd.xlane.f32.xlu1 %v3261_v34 }
0x1dd0   : > { %v3263_v41 = vpop.xlane.xlu1 %3262 }
0x1dd1   : > { %v3264_v42 = vmul.f32 0.03125, %v3263_v41 }
0x1dd3   : > { %v3265_v43 = vadd.f32 1e-12, %v3264_v42 }
0x1dd5   : > { %4011 = vrsqrt.f32 %v3265_v43 }
0x1ddf   : > { %v4012_v44 = vpop.eup %4011 }
0x1de0   : > { %v3267_v45 = vmul.f32 %v4012_v44, %v3259_v32 }
0x1de2   : > { %v3274_v47 = vmul.f32 %v3550_v10, %v3267_v45 }
0x1de4   : > { %v3281_v48 = vadd.f32 %v3551_v46, %v3274_v47 }
0x1de6   : > { %3857 = vmatmul.mubr.msk.f32.vlgmr.msra.gmra.mrb[30].mxu0 %vm637_vm0, %v3281_v48 }
0x1eb9   : > { %v3356_v3 = vpop.f32.mrb[30].mxu0 }
0x1eba   : > { %v3357_v50 = vadd.f32 %v3356_v3, %v3286_v49  ;;  %v3858_v26 = vpop.f32.mrb[31].mxu0 }
0x1ebc   : > { %4013 = vtanh.f32 %v3357_v50 }
0x1ec6   : > { %v4014_v51 = vpop.eup %4013 }
0x1ec7   : > { %3362 = vst.msk [vmem:[%s632_s22] sm:$0x1] %vm3361_vm4, %v4014_v51 }
0x1ec8 PF: > { %s28_s0 = sadd.s32 1, %s4053_s0   ;;  %s4694_s27 = smov %s4045_s29 }
0x1ec9   : > { %p25_p7 = scmp.ge.s32.totalorder %s28_s0, 6   ;;  %s4695_s28 = smov %s4049_s30 }
0x1eca   : > { %s4696_s29 = smov %s4699_s19  ;;  %s4697_s30 = smov %s4703_s1 }
0x1ecb   :  { %27 = sbr.rel (!%p25_p7) target bundleno = 4 (0x4), region = 137 }

</bundles_post_ra>
